<compile_context>
chip_gen: v7x
topology: tpu7x:2x2x1
jax: 0.10.0
libtpu: 0.0.40
codegen_flags: <defaults>
</compile_context>

<pallas_src>
import jax
import jax.numpy as jnp
import numpy as np
from jax import lax
from jax.experimental import pallas as pl
from jax.experimental.pallas import tpu as pltpu


# Set to jnp.bfloat16 on v6e/v7x for ~2x MXU throughput (keep f32 accumulation; relax the
# reference tolerance accordingly).  f32 keeps the check below exact on all generations.
MXU_DTYPE = jnp.float32


# ---------------------------------------------------------------------------
# Pallas kernel: embedding + GRU recurrence + attention + output head in VMEM.
# ---------------------------------------------------------------------------
def encoder_kernel(tok_ref,        # [T*BP, 1] i32   time-major tokens (row k = t*BP + b)
                   lens_ref,       # [BP, 1]   i32   sequence lengths (GRU gate)
                   lens_att_ref,   # [BP, 1]   i32   min(lens, max(lens)-1) (attention mask)
                   emb_ref,        # [VP, HP]  f32   padded embedding table
                   wi_ref,         # [HP, 3*HP] f32  [W_ir|W_iz|W_in]^T, gate blocks lane-aligned
                   wh_ref,         # [HP, 3*HP] f32  [W_hr|W_hz|W_hn]^T
                   bi_ref,         # [1, 3*HP]  f32  input biases per gate block
                   bh_ref,         # [1, 3*HP]  f32  hidden biases per gate block
                   wattn_ref,      # [HP, HP]   f32  (PyTorch orientation: v = h @ W_attn)
                   wout_ref,       # [HP, 2]    f32  W_out^T
                   bout_ref,       # [1, 2]     f32
                   out_ref,        # OUT [BP, 2] f32
                   gi_scr,         # scratch VMEM [T*BP, 3*HP] f32  hoisted input projections
                   out_scr):       # scratch VMEM [T, BP, HP]  f32  GRU outputs
    T, BP, HP = out_scr.shape
    TB = T * BP
    VP = emb_ref.shape[0]

    # ---- fused embedding lookup (one-hot @ table) + hoisted input projections ----
    # TODO(synk): large-vocab path: keep emb in HBM (pl.ANY) and DMA-gather rows instead.
    tok = tok_ref[...]                                                        # [TB, 1]
    onehot = (lax.broadcasted_iota(jnp.int32, (TB, VP), 1) == tok
              ).astype(MXU_DTYPE)                                             # [TB, VP]
    x = jnp.dot(onehot, emb_ref[...].astype(MXU_DTYPE),
                preferred_element_type=jnp.float32)                           # [TB, HP]
    gi_scr[...] = (jnp.dot(x.astype(MXU_DTYPE), wi_ref[...].astype(MXU_DTYPE),
                           preferred_element_type=jnp.float32)
                   + bi_ref[...])                                             # [TB, 3HP]

    lens_col = lens_ref[...]                                                  # [BP, 1]
    bh_b = jnp.broadcast_to(bh_ref[...], (BP, 3 * HP))    # hoisted: no per-step broadcast

    # ---- GRU recurrence.  T is tiny & static here -> full unroll is intentional. ----
    h = jnp.zeros((BP, HP), jnp.float32)
    for t in range(T):
        gi = gi_scr[t * BP:(t + 1) * BP, :]               # aligned full-(8,128)-tile load
        gh = (jnp.dot(h.astype(MXU_DTYPE), wh_ref[...].astype(MXU_DTYPE),
                      preferred_element_type=jnp.float32) + bh_b)             # [BP, 3HP]
        r = jax.nn.sigmoid(gi[:, 0:HP] + gh[:, 0:HP])
        z = jax.nn.sigmoid(gi[:, HP:2 * HP] + gh[:, HP:2 * HP])
        n = jnp.tanh(gi[:, 2 * HP:3 * HP] + r * gh[:, 2 * HP:3 * HP])
        h_new = n + z * (h - n)                           # == (1 - z) * n + z * h
        valid = t < lens_col                                                  # [BP, 1]
        # pack_padded emulation: outputs zeroed past each length; ONE aligned tile store.
        out_scr[t] = jnp.where(valid, h_new, 0.0)
        # hidden stops updating once t >= lens[b]  (== packed-GRU final hidden state)
        h = jnp.where(valid, h_new, h)
    h_final = h

    # ---- attention: block-diagonal aware (per-b lane reduce, no dense [B, B*T] scores) ----
    outs = out_scr[...]                                                       # [T, BP, HP]
    v = jnp.dot(h_final, wattn_ref[...], preferred_element_type=jnp.float32)  # [BP, HP]
    # <h, b_attn> constant dropped: per-b constant over t, cancels exactly in the softmax.
    scores = jnp.sum(outs * v[None, :, :], axis=2, keepdims=True)             # [T, BP, 1]
    t_iota = lax.broadcasted_iota(jnp.int32, (T, BP, 1), 0)
    mask = t_iota <= lens_att_ref[...].reshape(1, BP, 1)                      # [T, BP, 1]
    scores = jnp.where(mask, scores, -jnp.inf)
    m = jnp.max(scores, axis=0, keepdims=True)                                # [1, BP, 1]
    p = jnp.exp(scores - m)
    w = p / jnp.sum(p, axis=0, keepdims=True)                                 # softmax over t
    context = jnp.sum(w * outs, axis=0)                                       # [BP, HP]

    # ---- output head + softmax ----
    logits = (jnp.dot(context, wout_ref[...], preferred_element_type=jnp.float32)
              + bout_ref[...])                                                # [BP, 2]
    lm = jnp.max(logits, axis=1, keepdims=True)
    le = jnp.exp(logits - lm)
    out_ref[...] = le / jnp.sum(le, axis=1, keepdims=True)


# ---------------------------------------------------------------------------
# Wrapper: weight packing / lane+sublane padding + pallas_call.  jit-compatible.
# ---------------------------------------------------------------------------
def _round_up(x, m):
    return (x + m - 1) // m * m


@jax.jit
def encoder_forward(tokens, lens, params):
    emb = params["embedding"]
    V1, H = emb.shape                       # V1 = voc_size + 1
    B, T = tokens.shape
    HP = _round_up(H, 128)                  # lane-pad hidden: each gate block = full lane tile
    VP = _round_up(V1, 128)
    BP = _round_up(B, 8)                    # sublane-pad batch: per-step tiles fully aligned
    f32 = jnp.float32

    def pad2(a, rows, cols):
        return jnp.zeros((rows, cols), f32).at[:a.shape[0], :a.shape[1]].set(a.astype(f32))

    emb_p = pad2(emb, VP, HP)

    # PyTorch GRU gate order: r, z, n.  Transpose to (in, out) and place each gate in its
    # own lane-aligned HP-wide block of a single [HP, 3*HP] matrix (padding stays zero).
    w_ih, w_hh = params["w_ih"], params["w_hh"]
    b_ih, b_hh = params["b_ih"], params["b_hh"]
    wi_cat = jnp.zeros((HP, 3 * HP), f32)
    wh_cat = jnp.zeros((HP, 3 * HP), f32)
    bi_cat = jnp.zeros((1, 3 * HP), f32)
    bh_cat = jnp.zeros((1, 3 * HP), f32)
    for g in range(3):
        wi_cat = wi_cat.at[:H, g * HP:g * HP + H].set(w_ih[g * H:(g + 1) * H, :].T.astype(f32))
        wh_cat = wh_cat.at[:H, g * HP:g * HP + H].set(w_hh[g * H:(g + 1) * H, :].T.astype(f32))
        bi_cat = bi_cat.at[0, g * HP:g * HP + H].set(b_ih[g * H:(g + 1) * H].astype(f32))
        bh_cat = bh_cat.at[0, g * HP:g * HP + H].set(b_hh[g * H:(g + 1) * H].astype(f32))

    w_attn_p = pad2(params["w_attn"], HP, HP)        # used as v = h @ W_attn (torch layout)
    w_out_p = pad2(params["w_out"].T, HP, 2)
    b_out = params["b_out"].reshape(1, 2).astype(f32)

    lens_i32 = lens.astype(jnp.int32)
    lens_col = jnp.zeros((BP, 1), jnp.int32).at[:B, 0].set(lens_i32)
    # reference mask (over pad_packed length max(lens)):  t <= lens[b]
    #   == t <= min(lens[b], max(lens) - 1) over the static T.
    # Padded batch rows get 0 so their softmax column keeps one un-masked entry (no NaN);
    # those rows are sliced off below and never touch real rows (attention is per-b now).
    lens_att = jnp.zeros((BP, 1), jnp.int32).at[:B, 0].set(
        jnp.minimum(lens_i32, jnp.max(lens_i32) - 1))

    # time-major tokens, batch padded to BP (padded rows -> token 0; gated off by lens)
    tok_tm = jnp.zeros((T, BP), jnp.int32).at[:, :B].set(
        jnp.transpose(tokens.astype(jnp.int32), (1, 0)))
    tok_tm = tok_tm.reshape(T * BP, 1)

    vmem = pl.BlockSpec(memory_space=pltpu.MemorySpace.VMEM)

    out = pl.pallas_call(
        encoder_kernel,
        out_shape=jax.ShapeDtypeStruct((BP, 2), jnp.float32),
        in_specs=[vmem] * 11,
        out_specs=vmem,
        scratch_shapes=[pltpu.VMEM((T * BP, 3 * HP), jnp.float32),  # hoisted input projections
                        pltpu.VMEM((T, BP, HP), jnp.float32)],      # GRU outputs (per-t tiles)
        compiler_params=pltpu.CompilerParams(vmem_limit_bytes=32 * 1024 * 1024),
    )(tok_tm, lens_col, lens_att,
      emb_p, wi_cat, wh_cat, bi_cat, bh_cat,
      w_attn_p, w_out_p, b_out)
    return out[:B]


# ---------------------------------------------------------------------------
# Pure-JAX reference (mirrors the PyTorch forward exactly).
# ---------------------------------------------------------------------------
def encoder_ref(tokens, lens, params):
    H = params["embedding"].shape[1]
    emb = params["embedding"][tokens]                              # [B, Tmax, H]
    T = int(jnp.max(lens))                                         # pad_packed length
    x = emb[:, :T, :].astype(jnp.float32)
    B = x.shape[0]
    W_ih, W_hh = params["w_ih"], params["w_hh"]
    b_ih, b_hh = params["b_ih"], params["b_hh"]
    h = jnp.zeros((B, H), jnp.float32)
    outs = []
    for t in range(T):
        x_t = x[:, t]
        gi = x_t @ W_ih.T + b_ih
        gh = h @ W_hh.T + b_hh
        r = jax.nn.sigmoid(gi[:, :H] + gh[:, :H])
        z = jax.nn.sigmoid(gi[:, H:2 * H] + gh[:, H:2 * H])
        n = jnp.tanh(gi[:, 2 * H:] + r * gh[:, 2 * H:])
        h_new = (1.0 - z) * n + z * h
        valid = (t < lens)[:, None]
        h = jnp.where(valid, h_new, h)
        outs.append(jnp.where(valid, h_new, 0.0))
    outs = jnp.stack(outs, axis=1)                                  # [B, T, H]
    energy = outs @ params["w_attn"].T + params["b_attn"]
    scores = jnp.sum(h[:, None, :] * energy, axis=2)                # [B, T]
    mask = jnp.arange(T)[None, :] <= lens[:, None]
    scores = jnp.where(mask, scores, -jnp.inf)
    w = jax.nn.softmax(scores, axis=1)
    ctx = jnp.einsum("bt,bth->bh", w, outs)
    logits = ctx @ params["w_out"].T + params["b_out"]
    return jax.nn.softmax(logits, axis=1)


def init_params(key, voc_size, hidden_size):
    H = hidden_size
    ks = jax.random.split(key, 9)
    bound = 1.0 / np.sqrt(H)
    u = lambda k, shape: jax.random.uniform(k, shape, jnp.float32, -bound, bound)
    return {
        "embedding": jax.random.normal(ks[0], (voc_size + 1, H), jnp.float32),
        "w_ih": u(ks[1], (3 * H, H)),
        "w_hh": u(ks[2], (3 * H, H)),
        "b_ih": u(ks[3], (3 * H,)),
        "b_hh": u(ks[4], (3 * H,)),
        "w_attn": u(ks[5], (H, H)),
        "b_attn": u(ks[6], (H,)),
        "w_out": u(ks[7], (2, H)),
        "b_out": u(ks[8], (2,)),
    }


if __name__ == "__main__":
    key = jax.random.PRNGKey(0)
    pkey, tkey = jax.random.split(key)
    B, T, V, H = 2, 8, 20, 32
    params = init_params(pkey, V, H)
    tokens = jax.random.randint(tkey, (B, T), 0, V + 1, dtype=jnp.int32)

    # lens sorted descending, as pack_padded_sequence requires; second case exercises
    # the max(lens) < Tmax path (static-T kernel must match dynamic-T torch semantics).
    for lens_list in ([8, 5], [6, 4]):
        lens = jnp.array(lens_list, dtype=jnp.int32)
        out = jax.block_until_ready(encoder_forward(tokens, lens, params))
        ref = encoder_ref(tokens, lens, params)
        assert out.shape == (B, 2)
        np.testing.assert_allclose(np.asarray(out), np.asarray(ref), atol=5e-5, rtol=1e-4)
    print("KERNEL_OK")
</pallas_src>

<mosaic_0001>
module attributes {stable_mosaic.version = 11 : i64} {
  func.func @encoder_kernel(%arg0: memref<64x1xi32, #tpu.memory_space<vmem>>, %arg1: memref<8x1xi32, #tpu.memory_space<vmem>>, %arg2: memref<8x1xi32, #tpu.memory_space<vmem>>, %arg3: memref<128x128xf32, #tpu.memory_space<vmem>>, %arg4: memref<128x384xf32, #tpu.memory_space<vmem>>, %arg5: memref<128x384xf32, #tpu.memory_space<vmem>>, %arg6: memref<1x384xf32, #tpu.memory_space<vmem>>, %arg7: memref<1x384xf32, #tpu.memory_space<vmem>>, %arg8: memref<128x128xf32, #tpu.memory_space<vmem>>, %arg9: memref<128x2xf32, #tpu.memory_space<vmem>>, %arg10: memref<1x2xf32, #tpu.memory_space<vmem>>, %arg11: memref<8x2xf32, #tpu.memory_space<vmem>>, %arg12: memref<64x384xf32, #tpu.memory_space<vmem>>, %arg13: memref<8x8x128xf32, #tpu.memory_space<vmem>>) attributes {dimension_semantics = [], scalar_prefetch = 0 : i64, scratch_operands = 2 : i64, tpu.core_type = #tpu.core_type<tc>} {
    %c0 = arith.constant 0 : index
    %c0_0 = arith.constant 0 : index
    %0 = vector.load %arg0[%c0, %c0_0] : memref<64x1xi32, #tpu.memory_space<vmem>>, vector<64x1xi32>
    %1 = tpu.iota {dimensions = array<i32: 1>} : vector<64x128xi32>
    %2 = vector.broadcast %0 : vector<64x1xi32> to vector<64x128xi32>
    %3 = arith.cmpi eq, %1, %2 : vector<64x128xi32>
    %4 = arith.extui %3 : vector<64x128xi1> to vector<64x128xi32>
    %5 = arith.sitofp %4 : vector<64x128xi32> to vector<64x128xf32>
    %c0_1 = arith.constant 0 : index
    %c0_2 = arith.constant 0 : index
    %6 = vector.load %arg3[%c0_1, %c0_2] : memref<128x128xf32, #tpu.memory_space<vmem>>, vector<128x128xf32>
    %cst = arith.constant dense<0.000000e+00> : vector<64x128xf32>
    %7 = tpu.matmul %5, %6, %cst {dimension_numbers = #tpu.dot_dimension_numbers<[1], [0], [0], [1], [0, 0, 1, 1], [], []>} : vector<64x128xf32>, vector<128x128xf32>, vector<64x128xf32> -> vector<64x128xf32>
    %c0_3 = arith.constant 0 : index
    %c0_4 = arith.constant 0 : index
    %8 = vector.load %arg4[%c0_3, %c0_4] : memref<128x384xf32, #tpu.memory_space<vmem>>, vector<128x384xf32>
    %cst_5 = arith.constant dense<0.000000e+00> : vector<64x384xf32>
    %9 = tpu.matmul %7, %8, %cst_5 {dimension_numbers = #tpu.dot_dimension_numbers<[1], [0], [0], [1], [0, 0, 1, 1], [], []>} : vector<64x128xf32>, vector<128x384xf32>, vector<64x384xf32> -> vector<64x384xf32>
    %c0_6 = arith.constant 0 : index
    %c0_7 = arith.constant 0 : index
    %10 = vector.load %arg6[%c0_6, %c0_7] : memref<1x384xf32, #tpu.memory_space<vmem>>, vector<1x384xf32>
    %11 = vector.broadcast %10 : vector<1x384xf32> to vector<64x384xf32>
    %12 = arith.addf %9, %11 : vector<64x384xf32>
    %c0_8 = arith.constant 0 : index
    %c0_9 = arith.constant 0 : index
    %13 = vector.load %arg12[%c0_8, %c0_9] : memref<64x384xf32, #tpu.memory_space<vmem>>, vector<64x384xf32>
    tpu.vector_store %arg12[%c0_8, %c0_9], %12 {strides = array<i32>} : memref<64x384xf32, #tpu.memory_space<vmem>>, vector<64x384xf32>,
    %c0_10 = arith.constant 0 : index
    %c0_11 = arith.constant 0 : index
    %14 = vector.load %arg1[%c0_10, %c0_11] : memref<8x1xi32, #tpu.memory_space<vmem>>, vector<8x1xi32>
    %c0_12 = arith.constant 0 : index
    %c0_13 = arith.constant 0 : index
    %15 = vector.load %arg7[%c0_12, %c0_13] : memref<1x384xf32, #tpu.memory_space<vmem>>, vector<1x384xf32>
    %16 = vector.shape_cast %15 : vector<1x384xf32> to vector<1x384xf32>
    %17 = vector.broadcast %16 : vector<1x384xf32> to vector<8x384xf32>
    %cst_14 = arith.constant 0.000000e+00 : f32
    %18 = vector.broadcast %cst_14 : f32 to vector<8x128xf32>
    %c0_15 = arith.constant 0 : index
    %c0_16 = arith.constant 0 : index
    %19 = vector.load %arg12[%c0_15, %c0_16] : memref<64x384xf32, #tpu.memory_space<vmem>>, vector<8x384xf32>
    %c0_17 = arith.constant 0 : index
    %c0_18 = arith.constant 0 : index
    %20 = vector.load %arg5[%c0_17, %c0_18] : memref<128x384xf32, #tpu.memory_space<vmem>>, vector<128x384xf32>
    %cst_19 = arith.constant dense<0.000000e+00> : vector<8x384xf32>
    %21 = tpu.matmul %18, %20, %cst_19 {dimension_numbers = #tpu.dot_dimension_numbers<[1], [0], [0], [1], [0, 0, 1, 1], [], []>} : vector<8x128xf32>, vector<128x384xf32>, vector<8x384xf32> -> vector<8x384xf32>
    %22 = arith.addf %21, %17 : vector<8x384xf32>
    %23 = vector.extract_strided_slice %19 {offsets = [0, 0], sizes = [8, 128], strides = [1, 1]} : vector<8x384xf32> to vector<8x128xf32>
    %24 = vector.extract_strided_slice %22 {offsets = [0, 0], sizes = [8, 128], strides = [1, 1]} : vector<8x384xf32> to vector<8x128xf32>
    %25 = arith.addf %23, %24 : vector<8x128xf32>
    %26 = arith.negf %25 : vector<8x128xf32>
    %27 = math.exp %26 : vector<8x128xf32>
    %cst_20 = arith.constant 1.000000e+00 : f32
    %28 = vector.broadcast %cst_20 : f32 to vector<8x128xf32>
    %29 = arith.addf %28, %27 : vector<8x128xf32>
    %30 = arith.divf %28, %29 : vector<8x128xf32>
    %31 = vector.extract_strided_slice %19 {offsets = [0, 128], sizes = [8, 128], strides = [1, 1]} : vector<8x384xf32> to vector<8x128xf32>
    %32 = vector.extract_strided_slice %22 {offsets = [0, 128], sizes = [8, 128], strides = [1, 1]} : vector<8x384xf32> to vector<8x128xf32>
    %33 = arith.addf %31, %32 : vector<8x128xf32>
    %34 = arith.negf %33 : vector<8x128xf32>
    %35 = math.exp %34 : vector<8x128xf32>
    %cst_21 = arith.constant 1.000000e+00 : f32
    %36 = vector.broadcast %cst_21 : f32 to vector<8x128xf32>
    %37 = arith.addf %36, %35 : vector<8x128xf32>
    %38 = arith.divf %36, %37 : vector<8x128xf32>
    %39 = vector.extract_strided_slice %19 {offsets = [0, 256], sizes = [8, 128], strides = [1, 1]} : vector<8x384xf32> to vector<8x128xf32>
    %40 = vector.extract_strided_slice %22 {offsets = [0, 256], sizes = [8, 128], strides = [1, 1]} : vector<8x384xf32> to vector<8x128xf32>
    %41 = arith.mulf %30, %40 : vector<8x128xf32>
    %42 = arith.addf %39, %41 : vector<8x128xf32>
    %43 = math.tanh %42 : vector<8x128xf32>
    %44 = arith.subf %18, %43 : vector<8x128xf32>
    %45 = arith.mulf %38, %44 : vector<8x128xf32>
    %46 = arith.addf %43, %45 : vector<8x128xf32>
    %c0_i32 = arith.constant 0 : i32
    %47 = vector.broadcast %c0_i32 : i32 to vector<8x1xi32>
    %48 = arith.cmpi sgt, %14, %47 : vector<8x1xi32>
    %cst_22 = arith.constant 0.000000e+00 : f32
    %49 = vector.shape_cast %48 : vector<8x1xi1> to vector<8x1xi1>
    %50 = vector.broadcast %49 : vector<8x1xi1> to vector<8x128xi1>
    %51 = vector.broadcast %cst_22 : f32 to vector<8x128xf32>
    %52 = arith.select %50, %46, %51 : vector<8x128xi1>, vector<8x128xf32>
    %c0_23 = arith.constant 0 : index
    %c0_24 = arith.constant 0 : index
    %c0_25 = arith.constant 0 : index
    %53 = vector.load %arg13[%c0_23, %c0_24, %c0_25] : memref<8x8x128xf32, #tpu.memory_space<vmem>>, vector<1x8x128xf32>
    %54 = vector.shape_cast %53 : vector<1x8x128xf32> to vector<8x128xf32>
    %55 = vector.shape_cast %52 : vector<8x128xf32> to vector<1x8x128xf32>
    tpu.vector_store %arg13[%c0_23, %c0_24, %c0_25], %55 {strides = array<i32>} : memref<8x8x128xf32, #tpu.memory_space<vmem>>, vector<1x8x128xf32>,
    %56 = vector.shape_cast %48 : vector<8x1xi1> to vector<8x1xi1>
    %57 = vector.broadcast %56 : vector<8x1xi1> to vector<8x128xi1>
    %58 = arith.select %57, %46, %18 : vector<8x128xi1>, vector<8x128xf32>
    %c8 = arith.constant 8 : index
    %c0_26 = arith.constant 0 : index
    %59 = vector.load %arg12[%c8, %c0_26] : memref<64x384xf32, #tpu.memory_space<vmem>>, vector<8x384xf32>
    %c0_27 = arith.constant 0 : index
    %c0_28 = arith.constant 0 : index
    %60 = vector.load %arg5[%c0_27, %c0_28] : memref<128x384xf32, #tpu.memory_space<vmem>>, vector<128x384xf32>
    %cst_29 = arith.constant dense<0.000000e+00> : vector<8x384xf32>
    %61 = tpu.matmul %58, %60, %cst_29 {dimension_numbers = #tpu.dot_dimension_numbers<[1], [0], [0], [1], [0, 0, 1, 1], [], []>} : vector<8x128xf32>, vector<128x384xf32>, vector<8x384xf32> -> vector<8x384xf32>
    %62 = arith.addf %61, %17 : vector<8x384xf32>
    %63 = vector.extract_strided_slice %59 {offsets = [0, 0], sizes = [8, 128], strides = [1, 1]} : vector<8x384xf32> to vector<8x128xf32>
    %64 = vector.extract_strided_slice %62 {offsets = [0, 0], sizes = [8, 128], strides = [1, 1]} : vector<8x384xf32> to vector<8x128xf32>
    %65 = arith.addf %63, %64 : vector<8x128xf32>
    %66 = arith.negf %65 : vector<8x128xf32>
    %67 = math.exp %66 : vector<8x128xf32>
    %cst_30 = arith.constant 1.000000e+00 : f32
    %68 = vector.broadcast %cst_30 : f32 to vector<8x128xf32>
    %69 = arith.addf %68, %67 : vector<8x128xf32>
    %70 = arith.divf %68, %69 : vector<8x128xf32>
    %71 = vector.extract_strided_slice %59 {offsets = [0, 128], sizes = [8, 128], strides = [1, 1]} : vector<8x384xf32> to vector<8x128xf32>
    %72 = vector.extract_strided_slice %62 {offsets = [0, 128], sizes = [8, 128], strides = [1, 1]} : vector<8x384xf32> to vector<8x128xf32>
    %73 = arith.addf %71, %72 : vector<8x128xf32>
    %74 = arith.negf %73 : vector<8x128xf32>
    %75 = math.exp %74 : vector<8x128xf32>
    %cst_31 = arith.constant 1.000000e+00 : f32
    %76 = vector.broadcast %cst_31 : f32 to vector<8x128xf32>
    %77 = arith.addf %76, %75 : vector<8x128xf32>
    %78 = arith.divf %76, %77 : vector<8x128xf32>
    %79 = vector.extract_strided_slice %59 {offsets = [0, 256], sizes = [8, 128], strides = [1, 1]} : vector<8x384xf32> to vector<8x128xf32>
    %80 = vector.extract_strided_slice %62 {offsets = [0, 256], sizes = [8, 128], strides = [1, 1]} : vector<8x384xf32> to vector<8x128xf32>
    %81 = arith.mulf %70, %80 : vector<8x128xf32>
    %82 = arith.addf %79, %81 : vector<8x128xf32>
    %83 = math.tanh %82 : vector<8x128xf32>
    %84 = arith.subf %58, %83 : vector<8x128xf32>
    %85 = arith.mulf %78, %84 : vector<8x128xf32>
    %86 = arith.addf %83, %85 : vector<8x128xf32>
    %c1_i32 = arith.constant 1 : i32
    %87 = vector.broadcast %c1_i32 : i32 to vector<8x1xi32>
    %88 = arith.cmpi sgt, %14, %87 : vector<8x1xi32>
    %cst_32 = arith.constant 0.000000e+00 : f32
    %89 = vector.shape_cast %88 : vector<8x1xi1> to vector<8x1xi1>
    %90 = vector.broadcast %89 : vector<8x1xi1> to vector<8x128xi1>
    %91 = vector.broadcast %cst_32 : f32 to vector<8x128xf32>
    %92 = arith.select %90, %86, %91 : vector<8x128xi1>, vector<8x128xf32>
    %c1 = arith.constant 1 : index
    %c0_33 = arith.constant 0 : index
    %c0_34 = arith.constant 0 : index
    %93 = vector.load %arg13[%c1, %c0_33, %c0_34] : memref<8x8x128xf32, #tpu.memory_space<vmem>>, vector<1x8x128xf32>
    %94 = vector.shape_cast %93 : vector<1x8x128xf32> to vector<8x128xf32>
    %95 = vector.shape_cast %92 : vector<8x128xf32> to vector<1x8x128xf32>
    tpu.vector_store %arg13[%c1, %c0_33, %c0_34], %95 {strides = array<i32>} : memref<8x8x128xf32, #tpu.memory_space<vmem>>, vector<1x8x128xf32>,
    %96 = vector.shape_cast %88 : vector<8x1xi1> to vector<8x1xi1>
    %97 = vector.broadcast %96 : vector<8x1xi1> to vector<8x128xi1>
    %98 = arith.select %97, %86, %58 : vector<8x128xi1>, vector<8x128xf32>
    %c16 = arith.constant 16 : index
    %c0_35 = arith.constant 0 : index
    %99 = vector.load %arg12[%c16, %c0_35] : memref<64x384xf32, #tpu.memory_space<vmem>>, vector<8x384xf32>
    %c0_36 = arith.constant 0 : index
    %c0_37 = arith.constant 0 : index
    %100 = vector.load %arg5[%c0_36, %c0_37] : memref<128x384xf32, #tpu.memory_space<vmem>>, vector<128x384xf32>
    %cst_38 = arith.constant dense<0.000000e+00> : vector<8x384xf32>
    %101 = tpu.matmul %98, %100, %cst_38 {dimension_numbers = #tpu.dot_dimension_numbers<[1], [0], [0], [1], [0, 0, 1, 1], [], []>} : vector<8x128xf32>, vector<128x384xf32>, vector<8x384xf32> -> vector<8x384xf32>
    %102 = arith.addf %101, %17 : vector<8x384xf32>
    %103 = vector.extract_strided_slice %99 {offsets = [0, 0], sizes = [8, 128], strides = [1, 1]} : vector<8x384xf32> to vector<8x128xf32>
    %104 = vector.extract_strided_slice %102 {offsets = [0, 0], sizes = [8, 128], strides = [1, 1]} : vector<8x384xf32> to vector<8x128xf32>
    %105 = arith.addf %103, %104 : vector<8x128xf32>
    %106 = arith.negf %105 : vector<8x128xf32>
    %107 = math.exp %106 : vector<8x128xf32>
    %cst_39 = arith.constant 1.000000e+00 : f32
    %108 = vector.broadcast %cst_39 : f32 to vector<8x128xf32>
    %109 = arith.addf %108, %107 : vector<8x128xf32>
    %110 = arith.divf %108, %109 : vector<8x128xf32>
    %111 = vector.extract_strided_slice %99 {offsets = [0, 128], sizes = [8, 128], strides = [1, 1]} : vector<8x384xf32> to vector<8x128xf32>
    %112 = vector.extract_strided_slice %102 {offsets = [0, 128], sizes = [8, 128], strides = [1, 1]} : vector<8x384xf32> to vector<8x128xf32>
    %113 = arith.addf %111, %112 : vector<8x128xf32>
    %114 = arith.negf %113 : vector<8x128xf32>
    %115 = math.exp %114 : vector<8x128xf32>
    %cst_40 = arith.constant 1.000000e+00 : f32
    %116 = vector.broadcast %cst_40 : f32 to vector<8x128xf32>
    %117 = arith.addf %116, %115 : vector<8x128xf32>
    %118 = arith.divf %116, %117 : vector<8x128xf32>
    %119 = vector.extract_strided_slice %99 {offsets = [0, 256], sizes = [8, 128], strides = [1, 1]} : vector<8x384xf32> to vector<8x128xf32>
    %120 = vector.extract_strided_slice %102 {offsets = [0, 256], sizes = [8, 128], strides = [1, 1]} : vector<8x384xf32> to vector<8x128xf32>
    %121 = arith.mulf %110, %120 : vector<8x128xf32>
    %122 = arith.addf %119, %121 : vector<8x128xf32>
    %123 = math.tanh %122 : vector<8x128xf32>
    %124 = arith.subf %98, %123 : vector<8x128xf32>
    %125 = arith.mulf %118, %124 : vector<8x128xf32>
    %126 = arith.addf %123, %125 : vector<8x128xf32>
    %c2_i32 = arith.constant 2 : i32
    %127 = vector.broadcast %c2_i32 : i32 to vector<8x1xi32>
    %128 = arith.cmpi sgt, %14, %127 : vector<8x1xi32>
    %cst_41 = arith.constant 0.000000e+00 : f32
    %129 = vector.shape_cast %128 : vector<8x1xi1> to vector<8x1xi1>
    %130 = vector.broadcast %129 : vector<8x1xi1> to vector<8x128xi1>
    %131 = vector.broadcast %cst_41 : f32 to vector<8x128xf32>
    %132 = arith.select %130, %126, %131 : vector<8x128xi1>, vector<8x128xf32>
    %c2 = arith.constant 2 : index
    %c0_42 = arith.constant 0 : index
    %c0_43 = arith.constant 0 : index
    %133 = vector.load %arg13[%c2, %c0_42, %c0_43] : memref<8x8x128xf32, #tpu.memory_space<vmem>>, vector<1x8x128xf32>
    %134 = vector.shape_cast %133 : vector<1x8x128xf32> to vector<8x128xf32>
    %135 = vector.shape_cast %132 : vector<8x128xf32> to vector<1x8x128xf32>
    tpu.vector_store %arg13[%c2, %c0_42, %c0_43], %135 {strides = array<i32>} : memref<8x8x128xf32, #tpu.memory_space<vmem>>, vector<1x8x128xf32>,
    %136 = vector.shape_cast %128 : vector<8x1xi1> to vector<8x1xi1>
    %137 = vector.broadcast %136 : vector<8x1xi1> to vector<8x128xi1>
    %138 = arith.select %137, %126, %98 : vector<8x128xi1>, vector<8x128xf32>
    %c24 = arith.constant 24 : index
    %c0_44 = arith.constant 0 : index
    %139 = vector.load %arg12[%c24, %c0_44] : memref<64x384xf32, #tpu.memory_space<vmem>>, vector<8x384xf32>
    %c0_45 = arith.constant 0 : index
    %c0_46 = arith.constant 0 : index
    %140 = vector.load %arg5[%c0_45, %c0_46] : memref<128x384xf32, #tpu.memory_space<vmem>>, vector<128x384xf32>
    %cst_47 = arith.constant dense<0.000000e+00> : vector<8x384xf32>
    %141 = tpu.matmul %138, %140, %cst_47 {dimension_numbers = #tpu.dot_dimension_numbers<[1], [0], [0], [1], [0, 0, 1, 1], [], []>} : vector<8x128xf32>, vector<128x384xf32>, vector<8x384xf32> -> vector<8x384xf32>
    %142 = arith.addf %141, %17 : vector<8x384xf32>
    %143 = vector.extract_strided_slice %139 {offsets = [0, 0], sizes = [8, 128], strides = [1, 1]} : vector<8x384xf32> to vector<8x128xf32>
    %144 = vector.extract_strided_slice %142 {offsets = [0, 0], sizes = [8, 128], strides = [1, 1]} : vector<8x384xf32> to vector<8x128xf32>
    %145 = arith.addf %143, %144 : vector<8x128xf32>
    %146 = arith.negf %145 : vector<8x128xf32>
    %147 = math.exp %146 : vector<8x128xf32>
    %cst_48 = arith.constant 1.000000e+00 : f32
    %148 = vector.broadcast %cst_48 : f32 to vector<8x128xf32>
    %149 = arith.addf %148, %147 : vector<8x128xf32>
    %150 = arith.divf %148, %149 : vector<8x128xf32>
    %151 = vector.extract_strided_slice %139 {offsets = [0, 128], sizes = [8, 128], strides = [1, 1]} : vector<8x384xf32> to vector<8x128xf32>
    %152 = vector.extract_strided_slice %142 {offsets = [0, 128], sizes = [8, 128], strides = [1, 1]} : vector<8x384xf32> to vector<8x128xf32>
    %153 = arith.addf %151, %152 : vector<8x128xf32>
    %154 = arith.negf %153 : vector<8x128xf32>
    %155 = math.exp %154 : vector<8x128xf32>
    %cst_49 = arith.constant 1.000000e+00 : f32
    %156 = vector.broadcast %cst_49 : f32 to vector<8x128xf32>
    %157 = arith.addf %156, %155 : vector<8x128xf32>
    %158 = arith.divf %156, %157 : vector<8x128xf32>
    %159 = vector.extract_strided_slice %139 {offsets = [0, 256], sizes = [8, 128], strides = [1, 1]} : vector<8x384xf32> to vector<8x128xf32>
    %160 = vector.extract_strided_slice %142 {offsets = [0, 256], sizes = [8, 128], strides = [1, 1]} : vector<8x384xf32> to vector<8x128xf32>
    %161 = arith.mulf %150, %160 : vector<8x128xf32>
    %162 = arith.addf %159, %161 : vector<8x128xf32>
    %163 = math.tanh %162 : vector<8x128xf32>
    %164 = arith.subf %138, %163 : vector<8x128xf32>
    %165 = arith.mulf %158, %164 : vector<8x128xf32>
    %166 = arith.addf %163, %165 : vector<8x128xf32>
    %c3_i32 = arith.constant 3 : i32
    %167 = vector.broadcast %c3_i32 : i32 to vector<8x1xi32>
    %168 = arith.cmpi sgt, %14, %167 : vector<8x1xi32>
    %cst_50 = arith.constant 0.000000e+00 : f32
    %169 = vector.shape_cast %168 : vector<8x1xi1> to vector<8x1xi1>
    %170 = vector.broadcast %169 : vector<8x1xi1> to vector<8x128xi1>
    %171 = vector.broadcast %cst_50 : f32 to vector<8x128xf32>
    %172 = arith.select %170, %166, %171 : vector<8x128xi1>, vector<8x128xf32>
    %c3 = arith.constant 3 : index
    %c0_51 = arith.constant 0 : index
    %c0_52 = arith.constant 0 : index
    %173 = vector.load %arg13[%c3, %c0_51, %c0_52] : memref<8x8x128xf32, #tpu.memory_space<vmem>>, vector<1x8x128xf32>
    %174 = vector.shape_cast %173 : vector<1x8x128xf32> to vector<8x128xf32>
    %175 = vector.shape_cast %172 : vector<8x128xf32> to vector<1x8x128xf32>
    tpu.vector_store %arg13[%c3, %c0_51, %c0_52], %175 {strides = array<i32>} : memref<8x8x128xf32, #tpu.memory_space<vmem>>, vector<1x8x128xf32>,
    %176 = vector.shape_cast %168 : vector<8x1xi1> to vector<8x1xi1>
    %177 = vector.broadcast %176 : vector<8x1xi1> to vector<8x128xi1>
    %178 = arith.select %177, %166, %138 : vector<8x128xi1>, vector<8x128xf32>
    %c32 = arith.constant 32 : index
    %c0_53 = arith.constant 0 : index
    %179 = vector.load %arg12[%c32, %c0_53] : memref<64x384xf32, #tpu.memory_space<vmem>>, vector<8x384xf32>
    %c0_54 = arith.constant 0 : index
    %c0_55 = arith.constant 0 : index
    %180 = vector.load %arg5[%c0_54, %c0_55] : memref<128x384xf32, #tpu.memory_space<vmem>>, vector<128x384xf32>
    %cst_56 = arith.constant dense<0.000000e+00> : vector<8x384xf32>
    %181 = tpu.matmul %178, %180, %cst_56 {dimension_numbers = #tpu.dot_dimension_numbers<[1], [0], [0], [1], [0, 0, 1, 1], [], []>} : vector<8x128xf32>, vector<128x384xf32>, vector<8x384xf32> -> vector<8x384xf32>
    %182 = arith.addf %181, %17 : vector<8x384xf32>
    %183 = vector.extract_strided_slice %179 {offsets = [0, 0], sizes = [8, 128], strides = [1, 1]} : vector<8x384xf32> to vector<8x128xf32>
    %184 = vector.extract_strided_slice %182 {offsets = [0, 0], sizes = [8, 128], strides = [1, 1]} : vector<8x384xf32> to vector<8x128xf32>
    %185 = arith.addf %183, %184 : vector<8x128xf32>
    %186 = arith.negf %185 : vector<8x128xf32>
    %187 = math.exp %186 : vector<8x128xf32>
    %cst_57 = arith.constant 1.000000e+00 : f32
    %188 = vector.broadcast %cst_57 : f32 to vector<8x128xf32>
    %189 = arith.addf %188, %187 : vector<8x128xf32>
    %190 = arith.divf %188, %189 : vector<8x128xf32>
    %191 = vector.extract_strided_slice %179 {offsets = [0, 128], sizes = [8, 128], strides = [1, 1]} : vector<8x384xf32> to vector<8x128xf32>
    %192 = vector.extract_strided_slice %182 {offsets = [0, 128], sizes = [8, 128], strides = [1, 1]} : vector<8x384xf32> to vector<8x128xf32>
    %193 = arith.addf %191, %192 : vector<8x128xf32>
    %194 = arith.negf %193 : vector<8x128xf32>
    %195 = math.exp %194 : vector<8x128xf32>
    %cst_58 = arith.constant 1.000000e+00 : f32
    %196 = vector.broadcast %cst_58 : f32 to vector<8x128xf32>
    %197 = arith.addf %196, %195 : vector<8x128xf32>
    %198 = arith.divf %196, %197 : vector<8x128xf32>
    %199 = vector.extract_strided_slice %179 {offsets = [0, 256], sizes = [8, 128], strides = [1, 1]} : vector<8x384xf32> to vector<8x128xf32>
    %200 = vector.extract_strided_slice %182 {offsets = [0, 256], sizes = [8, 128], strides = [1, 1]} : vector<8x384xf32> to vector<8x128xf32>
    %201 = arith.mulf %190, %200 : vector<8x128xf32>
    %202 = arith.addf %199, %201 : vector<8x128xf32>
    %203 = math.tanh %202 : vector<8x128xf32>
    %204 = arith.subf %178, %203 : vector<8x128xf32>
    %205 = arith.mulf %198, %204 : vector<8x128xf32>
    %206 = arith.addf %203, %205 : vector<8x128xf32>
    %c4_i32 = arith.constant 4 : i32
    %207 = vector.broadcast %c4_i32 : i32 to vector<8x1xi32>
    %208 = arith.cmpi sgt, %14, %207 : vector<8x1xi32>
    %cst_59 = arith.constant 0.000000e+00 : f32
    %209 = vector.shape_cast %208 : vector<8x1xi1> to vector<8x1xi1>
    %210 = vector.broadcast %209 : vector<8x1xi1> to vector<8x128xi1>
    %211 = vector.broadcast %cst_59 : f32 to vector<8x128xf32>
    %212 = arith.select %210, %206, %211 : vector<8x128xi1>, vector<8x128xf32>
    %c4 = arith.constant 4 : index
    %c0_60 = arith.constant 0 : index
    %c0_61 = arith.constant 0 : index
    %213 = vector.load %arg13[%c4, %c0_60, %c0_61] : memref<8x8x128xf32, #tpu.memory_space<vmem>>, vector<1x8x128xf32>
    %214 = vector.shape_cast %213 : vector<1x8x128xf32> to vector<8x128xf32>
    %215 = vector.shape_cast %212 : vector<8x128xf32> to vector<1x8x128xf32>
    tpu.vector_store %arg13[%c4, %c0_60, %c0_61], %215 {strides = array<i32>} : memref<8x8x128xf32, #tpu.memory_space<vmem>>, vector<1x8x128xf32>,
    %216 = vector.shape_cast %208 : vector<8x1xi1> to vector<8x1xi1>
    %217 = vector.broadcast %216 : vector<8x1xi1> to vector<8x128xi1>
    %218 = arith.select %217, %206, %178 : vector<8x128xi1>, vector<8x128xf32>
    %c40 = arith.constant 40 : index
    %c0_62 = arith.constant 0 : index
    %219 = vector.load %arg12[%c40, %c0_62] : memref<64x384xf32, #tpu.memory_space<vmem>>, vector<8x384xf32>
    %c0_63 = arith.constant 0 : index
    %c0_64 = arith.constant 0 : index
    %220 = vector.load %arg5[%c0_63, %c0_64] : memref<128x384xf32, #tpu.memory_space<vmem>>, vector<128x384xf32>
    %cst_65 = arith.constant dense<0.000000e+00> : vector<8x384xf32>
    %221 = tpu.matmul %218, %220, %cst_65 {dimension_numbers = #tpu.dot_dimension_numbers<[1], [0], [0], [1], [0, 0, 1, 1], [], []>} : vector<8x128xf32>, vector<128x384xf32>, vector<8x384xf32> -> vector<8x384xf32>
    %222 = arith.addf %221, %17 : vector<8x384xf32>
    %223 = vector.extract_strided_slice %219 {offsets = [0, 0], sizes = [8, 128], strides = [1, 1]} : vector<8x384xf32> to vector<8x128xf32>
    %224 = vector.extract_strided_slice %222 {offsets = [0, 0], sizes = [8, 128], strides = [1, 1]} : vector<8x384xf32> to vector<8x128xf32>
    %225 = arith.addf %223, %224 : vector<8x128xf32>
    %226 = arith.negf %225 : vector<8x128xf32>
    %227 = math.exp %226 : vector<8x128xf32>
    %cst_66 = arith.constant 1.000000e+00 : f32
    %228 = vector.broadcast %cst_66 : f32 to vector<8x128xf32>
    %229 = arith.addf %228, %227 : vector<8x128xf32>
    %230 = arith.divf %228, %229 : vector<8x128xf32>
    %231 = vector.extract_strided_slice %219 {offsets = [0, 128], sizes = [8, 128], strides = [1, 1]} : vector<8x384xf32> to vector<8x128xf32>
    %232 = vector.extract_strided_slice %222 {offsets = [0, 128], sizes = [8, 128], strides = [1, 1]} : vector<8x384xf32> to vector<8x128xf32>
    %233 = arith.addf %231, %232 : vector<8x128xf32>
    %234 = arith.negf %233 : vector<8x128xf32>
    %235 = math.exp %234 : vector<8x128xf32>
    %cst_67 = arith.constant 1.000000e+00 : f32
    %236 = vector.broadcast %cst_67 : f32 to vector<8x128xf32>
    %237 = arith.addf %236, %235 : vector<8x128xf32>
    %238 = arith.divf %236, %237 : vector<8x128xf32>
    %239 = vector.extract_strided_slice %219 {offsets = [0, 256], sizes = [8, 128], strides = [1, 1]} : vector<8x384xf32> to vector<8x128xf32>
    %240 = vector.extract_strided_slice %222 {offsets = [0, 256], sizes = [8, 128], strides = [1, 1]} : vector<8x384xf32> to vector<8x128xf32>
    %241 = arith.mulf %230, %240 : vector<8x128xf32>
    %242 = arith.addf %239, %241 : vector<8x128xf32>
    %243 = math.tanh %242 : vector<8x128xf32>
    %244 = arith.subf %218, %243 : vector<8x128xf32>
    %245 = arith.mulf %238, %244 : vector<8x128xf32>
    %246 = arith.addf %243, %245 : vector<8x128xf32>
    %c5_i32 = arith.constant 5 : i32
    %247 = vector.broadcast %c5_i32 : i32 to vector<8x1xi32>
    %248 = arith.cmpi sgt, %14, %247 : vector<8x1xi32>
    %cst_68 = arith.constant 0.000000e+00 : f32
    %249 = vector.shape_cast %248 : vector<8x1xi1> to vector<8x1xi1>
    %250 = vector.broadcast %249 : vector<8x1xi1> to vector<8x128xi1>
    %251 = vector.broadcast %cst_68 : f32 to vector<8x128xf32>
    %252 = arith.select %250, %246, %251 : vector<8x128xi1>, vector<8x128xf32>
    %c5 = arith.constant 5 : index
    %c0_69 = arith.constant 0 : index
    %c0_70 = arith.constant 0 : index
    %253 = vector.load %arg13[%c5, %c0_69, %c0_70] : memref<8x8x128xf32, #tpu.memory_space<vmem>>, vector<1x8x128xf32>
    %254 = vector.shape_cast %253 : vector<1x8x128xf32> to vector<8x128xf32>
    %255 = vector.shape_cast %252 : vector<8x128xf32> to vector<1x8x128xf32>
    tpu.vector_store %arg13[%c5, %c0_69, %c0_70], %255 {strides = array<i32>} : memref<8x8x128xf32, #tpu.memory_space<vmem>>, vector<1x8x128xf32>,
    %256 = vector.shape_cast %248 : vector<8x1xi1> to vector<8x1xi1>
    %257 = vector.broadcast %256 : vector<8x1xi1> to vector<8x128xi1>
    %258 = arith.select %257, %246, %218 : vector<8x128xi1>, vector<8x128xf32>
    %c48 = arith.constant 48 : index
    %c0_71 = arith.constant 0 : index
    %259 = vector.load %arg12[%c48, %c0_71] : memref<64x384xf32, #tpu.memory_space<vmem>>, vector<8x384xf32>
    %c0_72 = arith.constant 0 : index
    %c0_73 = arith.constant 0 : index
    %260 = vector.load %arg5[%c0_72, %c0_73] : memref<128x384xf32, #tpu.memory_space<vmem>>, vector<128x384xf32>
    %cst_74 = arith.constant dense<0.000000e+00> : vector<8x384xf32>
    %261 = tpu.matmul %258, %260, %cst_74 {dimension_numbers = #tpu.dot_dimension_numbers<[1], [0], [0], [1], [0, 0, 1, 1], [], []>} : vector<8x128xf32>, vector<128x384xf32>, vector<8x384xf32> -> vector<8x384xf32>
    %262 = arith.addf %261, %17 : vector<8x384xf32>
    %263 = vector.extract_strided_slice %259 {offsets = [0, 0], sizes = [8, 128], strides = [1, 1]} : vector<8x384xf32> to vector<8x128xf32>
    %264 = vector.extract_strided_slice %262 {offsets = [0, 0], sizes = [8, 128], strides = [1, 1]} : vector<8x384xf32> to vector<8x128xf32>
    %265 = arith.addf %263, %264 : vector<8x128xf32>
    %266 = arith.negf %265 : vector<8x128xf32>
    %267 = math.exp %266 : vector<8x128xf32>
    %cst_75 = arith.constant 1.000000e+00 : f32
    %268 = vector.broadcast %cst_75 : f32 to vector<8x128xf32>
    %269 = arith.addf %268, %267 : vector<8x128xf32>
    %270 = arith.divf %268, %269 : vector<8x128xf32>
    %271 = vector.extract_strided_slice %259 {offsets = [0, 128], sizes = [8, 128], strides = [1, 1]} : vector<8x384xf32> to vector<8x128xf32>
    %272 = vector.extract_strided_slice %262 {offsets = [0, 128], sizes = [8, 128], strides = [1, 1]} : vector<8x384xf32> to vector<8x128xf32>
    %273 = arith.addf %271, %272 : vector<8x128xf32>
    %274 = arith.negf %273 : vector<8x128xf32>
    %275 = math.exp %274 : vector<8x128xf32>
    %cst_76 = arith.constant 1.000000e+00 : f32
    %276 = vector.broadcast %cst_76 : f32 to vector<8x128xf32>
    %277 = arith.addf %276, %275 : vector<8x128xf32>
    %278 = arith.divf %276, %277 : vector<8x128xf32>
    %279 = vector.extract_strided_slice %259 {offsets = [0, 256], sizes = [8, 128], strides = [1, 1]} : vector<8x384xf32> to vector<8x128xf32>
    %280 = vector.extract_strided_slice %262 {offsets = [0, 256], sizes = [8, 128], strides = [1, 1]} : vector<8x384xf32> to vector<8x128xf32>
    %281 = arith.mulf %270, %280 : vector<8x128xf32>
    %282 = arith.addf %279, %281 : vector<8x128xf32>
    %283 = math.tanh %282 : vector<8x128xf32>
    %284 = arith.subf %258, %283 : vector<8x128xf32>
    %285 = arith.mulf %278, %284 : vector<8x128xf32>
    %286 = arith.addf %283, %285 : vector<8x128xf32>
    %c6_i32 = arith.constant 6 : i32
    %287 = vector.broadcast %c6_i32 : i32 to vector<8x1xi32>
    %288 = arith.cmpi sgt, %14, %287 : vector<8x1xi32>
    %cst_77 = arith.constant 0.000000e+00 : f32
    %289 = vector.shape_cast %288 : vector<8x1xi1> to vector<8x1xi1>
    %290 = vector.broadcast %289 : vector<8x1xi1> to vector<8x128xi1>
    %291 = vector.broadcast %cst_77 : f32 to vector<8x128xf32>
    %292 = arith.select %290, %286, %291 : vector<8x128xi1>, vector<8x128xf32>
    %c6 = arith.constant 6 : index
    %c0_78 = arith.constant 0 : index
    %c0_79 = arith.constant 0 : index
    %293 = vector.load %arg13[%c6, %c0_78, %c0_79] : memref<8x8x128xf32, #tpu.memory_space<vmem>>, vector<1x8x128xf32>
    %294 = vector.shape_cast %293 : vector<1x8x128xf32> to vector<8x128xf32>
    %295 = vector.shape_cast %292 : vector<8x128xf32> to vector<1x8x128xf32>
    tpu.vector_store %arg13[%c6, %c0_78, %c0_79], %295 {strides = array<i32>} : memref<8x8x128xf32, #tpu.memory_space<vmem>>, vector<1x8x128xf32>,
    %296 = vector.shape_cast %288 : vector<8x1xi1> to vector<8x1xi1>
    %297 = vector.broadcast %296 : vector<8x1xi1> to vector<8x128xi1>
    %298 = arith.select %297, %286, %258 : vector<8x128xi1>, vector<8x128xf32>
    %c56 = arith.constant 56 : index
    %c0_80 = arith.constant 0 : index
    %299 = vector.load %arg12[%c56, %c0_80] : memref<64x384xf32, #tpu.memory_space<vmem>>, vector<8x384xf32>
    %c0_81 = arith.constant 0 : index
    %c0_82 = arith.constant 0 : index
    %300 = vector.load %arg5[%c0_81, %c0_82] : memref<128x384xf32, #tpu.memory_space<vmem>>, vector<128x384xf32>
    %cst_83 = arith.constant dense<0.000000e+00> : vector<8x384xf32>
    %301 = tpu.matmul %298, %300, %cst_83 {dimension_numbers = #tpu.dot_dimension_numbers<[1], [0], [0], [1], [0, 0, 1, 1], [], []>} : vector<8x128xf32>, vector<128x384xf32>, vector<8x384xf32> -> vector<8x384xf32>
    %302 = arith.addf %301, %17 : vector<8x384xf32>
    %303 = vector.extract_strided_slice %299 {offsets = [0, 0], sizes = [8, 128], strides = [1, 1]} : vector<8x384xf32> to vector<8x128xf32>
    %304 = vector.extract_strided_slice %302 {offsets = [0, 0], sizes = [8, 128], strides = [1, 1]} : vector<8x384xf32> to vector<8x128xf32>
    %305 = arith.addf %303, %304 : vector<8x128xf32>
    %306 = arith.negf %305 : vector<8x128xf32>
    %307 = math.exp %306 : vector<8x128xf32>
    %cst_84 = arith.constant 1.000000e+00 : f32
    %308 = vector.broadcast %cst_84 : f32 to vector<8x128xf32>
    %309 = arith.addf %308, %307 : vector<8x128xf32>
    %310 = arith.divf %308, %309 : vector<8x128xf32>
    %311 = vector.extract_strided_slice %299 {offsets = [0, 128], sizes = [8, 128], strides = [1, 1]} : vector<8x384xf32> to vector<8x128xf32>
    %312 = vector.extract_strided_slice %302 {offsets = [0, 128], sizes = [8, 128], strides = [1, 1]} : vector<8x384xf32> to vector<8x128xf32>
    %313 = arith.addf %311, %312 : vector<8x128xf32>
    %314 = arith.negf %313 : vector<8x128xf32>
    %315 = math.exp %314 : vector<8x128xf32>
    %cst_85 = arith.constant 1.000000e+00 : f32
    %316 = vector.broadcast %cst_85 : f32 to vector<8x128xf32>
    %317 = arith.addf %316, %315 : vector<8x128xf32>
    %318 = arith.divf %316, %317 : vector<8x128xf32>
    %319 = vector.extract_strided_slice %299 {offsets = [0, 256], sizes = [8, 128], strides = [1, 1]} : vector<8x384xf32> to vector<8x128xf32>
    %320 = vector.extract_strided_slice %302 {offsets = [0, 256], sizes = [8, 128], strides = [1, 1]} : vector<8x384xf32> to vector<8x128xf32>
    %321 = arith.mulf %310, %320 : vector<8x128xf32>
    %322 = arith.addf %319, %321 : vector<8x128xf32>
    %323 = math.tanh %322 : vector<8x128xf32>
    %324 = arith.subf %298, %323 : vector<8x128xf32>
    %325 = arith.mulf %318, %324 : vector<8x128xf32>
    %326 = arith.addf %323, %325 : vector<8x128xf32>
    %c7_i32 = arith.constant 7 : i32
    %327 = vector.broadcast %c7_i32 : i32 to vector<8x1xi32>
    %328 = arith.cmpi sgt, %14, %327 : vector<8x1xi32>
    %cst_86 = arith.constant 0.000000e+00 : f32
    %329 = vector.shape_cast %328 : vector<8x1xi1> to vector<8x1xi1>
    %330 = vector.broadcast %329 : vector<8x1xi1> to vector<8x128xi1>
    %331 = vector.broadcast %cst_86 : f32 to vector<8x128xf32>
    %332 = arith.select %330, %326, %331 : vector<8x128xi1>, vector<8x128xf32>
    %c7 = arith.constant 7 : index
    %c0_87 = arith.constant 0 : index
    %c0_88 = arith.constant 0 : index
    %333 = vector.load %arg13[%c7, %c0_87, %c0_88] : memref<8x8x128xf32, #tpu.memory_space<vmem>>, vector<1x8x128xf32>
    %334 = vector.shape_cast %333 : vector<1x8x128xf32> to vector<8x128xf32>
    %335 = vector.shape_cast %332 : vector<8x128xf32> to vector<1x8x128xf32>
    tpu.vector_store %arg13[%c7, %c0_87, %c0_88], %335 {strides = array<i32>} : memref<8x8x128xf32, #tpu.memory_space<vmem>>, vector<1x8x128xf32>,
    %336 = vector.shape_cast %328 : vector<8x1xi1> to vector<8x1xi1>
    %337 = vector.broadcast %336 : vector<8x1xi1> to vector<8x128xi1>
    %338 = arith.select %337, %326, %298 : vector<8x128xi1>, vector<8x128xf32>
    %c0_89 = arith.constant 0 : index
    %c0_90 = arith.constant 0 : index
    %c0_91 = arith.constant 0 : index
    %339 = vector.load %arg13[%c0_89, %c0_90, %c0_91] : memref<8x8x128xf32, #tpu.memory_space<vmem>>, vector<8x8x128xf32>
    %c0_92 = arith.constant 0 : index
    %c0_93 = arith.constant 0 : index
    %340 = vector.load %arg8[%c0_92, %c0_93] : memref<128x128xf32, #tpu.memory_space<vmem>>, vector<128x128xf32>
    %cst_94 = arith.constant dense<0.000000e+00> : vector<8x128xf32>
    %341 = tpu.matmul %338, %340, %cst_94 {dimension_numbers = #tpu.dot_dimension_numbers<[1], [0], [0], [1], [0, 0, 1, 1], [], []>} : vector<8x128xf32>, vector<128x128xf32>, vector<8x128xf32> -> vector<8x128xf32>
    %342 = vector.shape_cast %341 : vector<8x128xf32> to vector<1x8x128xf32>
    %343 = vector.broadcast %342 : vector<1x8x128xf32> to vector<8x8x128xf32>
    %344 = arith.mulf %339, %343 : vector<8x8x128xf32>
    %cst_95 = arith.constant dense<0.000000e+00> : vector<8x8xf32>
    %345 = vector.multi_reduction <add>, %344, %cst_95 [2] : vector<8x8x128xf32> to vector<8x8xf32>
    %346 = vector.shape_cast %345 : vector<8x8xf32> to vector<8x8x1xf32>
    %347 = tpu.iota {dimensions = array<i32: 0>} : vector<8x8x1xi32>
    %c0_96 = arith.constant 0 : index
    %c0_97 = arith.constant 0 : index
    %348 = vector.load %arg2[%c0_96, %c0_97] : memref<8x1xi32, #tpu.memory_space<vmem>>, vector<8x1xi32>
    %349 = vector.shape_cast %348 : vector<8x1xi32> to vector<1x8x1xi32>
    %350 = vector.broadcast %349 : vector<1x8x1xi32> to vector<8x8x1xi32>
    %351 = arith.cmpi sle, %347, %350 : vector<8x8x1xi32>
    %cst_98 = arith.constant 0xFF800000 : f32
    %352 = vector.broadcast %cst_98 : f32 to vector<8x8x1xf32>
    %353 = arith.select %351, %346, %352 : vector<8x8x1xi1>, vector<8x8x1xf32>
    %cst_99 = arith.constant dense<0xFF800000> : vector<8x1xf32>
    %354 = vector.multi_reduction <maximumf>, %353, %cst_99 [0] : vector<8x8x1xf32> to vector<8x1xf32>
    %355 = vector.shape_cast %354 : vector<8x1xf32> to vector<1x8x1xf32>
    %356 = vector.broadcast %355 : vector<1x8x1xf32> to vector<8x8x1xf32>
    %357 = arith.subf %353, %356 : vector<8x8x1xf32>
    %358 = math.exp %357 : vector<8x8x1xf32>
    %cst_100 = arith.constant dense<0.000000e+00> : vector<8x1xf32>
    %359 = vector.multi_reduction <add>, %358, %cst_100 [0] : vector<8x8x1xf32> to vector<8x1xf32>
    %360 = vector.shape_cast %359 : vector<8x1xf32> to vector<1x8x1xf32>
    %361 = vector.broadcast %360 : vector<1x8x1xf32> to vector<8x8x1xf32>
    %362 = arith.divf %358, %361 : vector<8x8x1xf32>
    %363 = vector.broadcast %362 : vector<8x8x1xf32> to vector<8x8x128xf32>
    %364 = arith.mulf %363, %339 : vector<8x8x128xf32>
    %cst_101 = arith.constant dense<0.000000e+00> : vector<8x128xf32>
    %365 = vector.multi_reduction <add>, %364, %cst_101 [0] : vector<8x8x128xf32> to vector<8x128xf32>
    %c0_102 = arith.constant 0 : index
    %c0_103 = arith.constant 0 : index
    %366 = vector.load %arg9[%c0_102, %c0_103] : memref<128x2xf32, #tpu.memory_space<vmem>>, vector<128x2xf32>
    %cst_104 = arith.constant dense<0.000000e+00> : vector<8x2xf32>
    %367 = tpu.matmul %365, %366, %cst_104 {dimension_numbers = #tpu.dot_dimension_numbers<[1], [0], [0], [1], [0, 0, 1, 1], [], []>} : vector<8x128xf32>, vector<128x2xf32>, vector<8x2xf32> -> vector<8x2xf32>
    %c0_105 = arith.constant 0 : index
    %c0_106 = arith.constant 0 : index
    %368 = vector.load %arg10[%c0_105, %c0_106] : memref<1x2xf32, #tpu.memory_space<vmem>>, vector<1x2xf32>
    %369 = vector.broadcast %368 : vector<1x2xf32> to vector<8x2xf32>
    %370 = arith.addf %367, %369 : vector<8x2xf32>
    %cst_107 = arith.constant dense<0xFF800000> : vector<8xf32>
    %371 = vector.multi_reduction <maximumf>, %370, %cst_107 [1] : vector<8x2xf32> to vector<8xf32>
    %372 = vector.shape_cast %371 : vector<8xf32> to vector<8x1xf32>
    %373 = vector.broadcast %372 : vector<8x1xf32> to vector<8x2xf32>
    %374 = arith.subf %370, %373 : vector<8x2xf32>
    %375 = math.exp %374 : vector<8x2xf32>
    %cst_108 = arith.constant dense<0.000000e+00> : vector<8xf32>
    %376 = vector.multi_reduction <add>, %375, %cst_108 [1] : vector<8x2xf32> to vector<8xf32>
    %377 = vector.shape_cast %376 : vector<8xf32> to vector<8x1xf32>
    %378 = vector.broadcast %377 : vector<8x1xf32> to vector<8x2xf32>
    %379 = arith.divf %375, %378 : vector<8x2xf32>
    %c0_109 = arith.constant 0 : index
    %c0_110 = arith.constant 0 : index
    %380 = vector.load %arg11[%c0_109, %c0_110] : memref<8x2xf32, #tpu.memory_space<vmem>>, vector<8x2xf32>
    tpu.vector_store %arg11[%c0_109, %c0_110], %379 {strides = array<i32>} : memref<8x2xf32, #tpu.memory_space<vmem>>, vector<8x2xf32>,
    return
  }
}

</mosaic_0001>

<bundles_post_ra>
// kernel: encoder_forward.1
= control target key start
LH: loop header
LB: loop body
LE: loop exit
PB: predicated region body
PF: predicated region fallthrough
CT: control target
= control target key end

     0   :  { %v4120_v0 = vmov 0   ;;  %s5369_s0 = inlined_call_operand.vmem [shape: s32[64,1], index: 0, kind: input, shape index: {}]   ;;  %s5370_s3 = inlined_call_operand.vmem [shape: f32[128,128], index: 3, kind: input, shape index: {}]   ;;  %s5371_s1 = inlined_call_operand.vmem [shape: s32[8,1], index: 1, kind: input, shape index: {}]   ;;  %s5372_s4 = inlined_call_operand.vmem [shape: f32[128,384], index: 4, kind: input, shape index: {}]   ;;  %s5373_s5 = inlined_call_operand.vmem [shape: f32[128,384], index: 5, kind: input, shape index: {}]   ;;  %s5374_s6 = inlined_call_operand.vmem [shape: f32[1,384], index: 6, kind: input, shape index: {}]   ;;  %s5375_s7 = inlined_call_operand.vmem [shape: f32[1,384], index: 7, kind: input, shape index: {}]   ;;  %s5376_s8 = inlined_call_operand.vmem [shape: f32[128,128], index: 8, kind: input, shape index: {}]   ;;  %s5377_s9 = inlined_call_operand.vmem [shape: f32[128,2], index: 9, kind: input, shape index: {}]   ;;  %s5378_s2 = inlined_call_operand.vmem [shape: s32[8,1], index: 2, kind: input, shape index: {}]   ;;  %s5379_s10 = inlined_call_operand.vmem [shape: f32[1,2], index: 10, kind: input, shape index: {}]   ;;  %s5380_s11 = inlined_call_operand.vmem [shape: f32[8,2], index: 11, kind: output, shape index: {}]  }
   0x1   :  { %4017 = vset.pattern.permute.xlu1 %v4120_v0  ;;  %4016 = vset.pattern.permute.xlu0 %v4120_v0  ;;  %v40_v1 = vld [vmem:[%s5369_s0 + $0x10] sm:$0xff]  ;;  %v38_v2 = vld [vmem:[%s5369_s0] sm:$0xff]  ;;  %v41_v3 = vld [vmem:[%s5369_s0 + $0x18] sm:$0xff] }
   0x2   :  { %55 = vperm.xlu1 %4017, %v40_v1   ;;  %49 = vperm.xlu0 %4016, %v38_v2   ;;  %v39_v4 = vld [vmem:[%s5369_s0 + $0x8] sm:$0xff]  ;;  %v96_v5 = vld [vmem:[%s5370_s3] sm:$0xff]  ;;  %v98_v7 = vld [vmem:[%s5370_s3 + $0x10] sm:$0xff] }
   0x3   :  { %v97_v6 = vld [vmem:[%s5370_s3 + $0x8] sm:$0xff]  ;;  %v99_v8 = vld [vmem:[%s5370_s3 + $0x18] sm:$0xff]  ;;  %v42_v10 = vld [vmem:[%s5369_s0 + $0x20] sm:$0xff] }
   0x4   :  { %v43_v9 = vld [vmem:[%s5369_s0 + $0x28] sm:$0xff]  ;;  %v3371_v11 = vpack.c.bf16 %v97_v6, %v96_v5  ;;  %v524_v12 = vld [vmem:[%s5371_s1] sm:$0xff]  ;;  %v3375_v13 = vpack.c.bf16 %v99_v8, %v98_v7  ;;  %v45_v16 = vld [vmem:[%s5369_s0 + $0x38] sm:$0xff] }
   0x5   :  { %v100_v14 = vld [vmem:[%s5370_s3 + $0x20] sm:$0xff]  ;;  %v101_v15 = vld [vmem:[%s5370_s3 + $0x28] sm:$0xff]  ;;  %v44_v17 = vld [vmem:[%s5369_s0 + $0x30] sm:$0xff]  ;;  %vm974_vm0 = vcmp.gt.s32.totalorder %v524_v12, 1  ;;  %vm754_vm1 = vcmp.gt.s32.totalorder %v524_v12, 0  ;;  %vm1418_vm2 = vcmp.gt.s32.totalorder %v524_v12, 3 }
   0x6   :  { %58 = vperm.xlu1 %4017, %v41_v3   ;;  %52 = vperm.xlu0 %4016, %v39_v4   ;;  %v3379_v18 = vpack.c.bf16 %v101_v15, %v100_v14  ;;  %v102_v19 = vld [vmem:[%s5370_s3 + $0x30] sm:$0xff]  ;;  %v103_v20 = vld [vmem:[%s5370_s3 + $0x38] sm:$0xff]  ;;  %v975_v21 = vsel %vm974_vm0, 1, %v4120_v0  ;;  %v755_v22 = vsel %vm754_vm1, 1, %v4120_v0  ;;  %vm1196_vm3 = vcmp.gt.s32.totalorder %v524_v12, 2  ;;  %v104_v24 = vld [vmem:[%s5370_s3 + $0x40] sm:$0xff] }
   0x7   :  { %3372 = vmatprep.subr.bf16.mxu0 %v3371_v11  ;;  %v3383_v23 = vpack.c.bf16 %v103_v20, %v102_v19  ;;  %v105_v25 = vld [vmem:[%s5370_s3 + $0x48] sm:$0xff]  ;;  %v1419_v26 = vsel %vm1418_vm2, 1, %v4120_v0  ;;  %v1197_v27 = vsel %vm1196_vm3, 1, %v4120_v0  ;;  %vm1862_vm4 = vcmp.gt.s32.totalorder %v524_v12, 5  ;;  %v106_v29 = vld [vmem:[%s5370_s3 + $0x50] sm:$0xff]  ;;  %v107_v30 = vld [vmem:[%s5370_s3 + $0x58] sm:$0xff] }
   0x8   :  { %3374 = vmatpush3.bf16.msra.mxu0 %v3371_v11  ;;  %vm1640_vm5 = vcmp.gt.s32.totalorder %v524_v12, 4  ;;  %v3387_v28 = vpack.c.bf16 %v105_v25, %v104_v24  ;;  %v1863_v31 = vsel %vm1862_vm4, 1, %v4120_v0  ;;  %vm2306_vm6 = vcmp.gt.s32.totalorder %v524_v12, 7  ;;  %v108_v34 = vld [vmem:[%s5370_s3 + $0x60] sm:$0xff]  ;;  %v109_v35 = vld [vmem:[%s5370_s3 + $0x68] sm:$0xff]  ;;  %v110_v39 = vld [vmem:[%s5370_s3 + $0x70] sm:$0xff] }
   0x9   :  { %3376 = vmatprep.subr.bf16.mxu0 %v3375_v13  ;;  %v1641_v32 = vsel %vm1640_vm5, 1, %v4120_v0  ;;  %vm2084_vm7 = vcmp.gt.s32.totalorder %v524_v12, 6  ;;  %v3391_v33 = vpack.c.bf16 %v107_v30, %v106_v29  ;;  %v2307_v36 = vsel %vm2306_vm6, 1, %v4120_v0  ;;  %v111_v40 = vld [vmem:[%s5370_s3 + $0x78] sm:$0xff]  ;;  %v218_v41 = vld [vmem:[%s5372_s4 + $0x8] sm:$0xff]  ;;  %v221_v42 = vld [vmem:[%s5372_s4 + $0x20] sm:$0xff] }
   0xa   :  { %64 = vperm.xlu1 %4017, %v43_v9   ;;  %61 = vperm.xlu0 %4016, %v42_v10   ;;  %v2085_v37 = vsel %vm2084_vm7, 1, %v4120_v0  ;;  %v3395_v38 = vpack.c.bf16 %v109_v35, %v108_v34  ;;  %v217_v43 = vld [vmem:[%s5372_s4] sm:$0xff]  ;;  %v3403_v44 = vpack.c.bf16 %v221_v42, %v218_v41  ;;  %v220_v45 = vld [vmem:[%s5372_s4 + $0x18] sm:$0xff]  ;;  %v3399_v46 = vpack.c.bf16 %v111_v40, %v110_v39  ;;  %v227_v49 = vld [vmem:[%s5372_s4 + $0x50] sm:$0xff] }
   0xb   :  { %v3405_v47 = vpack.c.bf16 %v220_v45, %v217_v43  ;;  %v224_v48 = vld [vmem:[%s5372_s4 + $0x38] sm:$0xff]  ;;  %v223_v50 = vld [vmem:[%s5372_s4 + $0x30] sm:$0xff]  ;;  %v222_v52 = vld [vmem:[%s5372_s4 + $0x28] sm:$0xff]  ;;  %v46_v29 = vlaneseq  ;;  %v4121_v35 = vmov 1.0   ;;  %vm4124_vm0 = vmmov 0  }
   0xc   :  { %3378 = vmatpush3.bf16.msra.mxu0 %v3375_v13  ;;  %3404 = vmatprep.subr.bf16.mxu1 %v3403_v44  ;;  %v219_v51 = vld [vmem:[%s5372_s4 + $0x10] sm:$0xff]  ;;  %v3407_v53 = vpack.c.bf16 %v227_v49, %v224_v48  ;;  %v226_v54 = vld [vmem:[%s5372_s4 + $0x48] sm:$0xff]  ;;  %v233_v57 = vld [vmem:[%s5372_s4 + $0x80] sm:$0xff] }
   0xd   :  { %3380 = vmatprep.subr.bf16.mxu0 %v3379_v18  ;;  %3406 = vmatpush1.bf16.msra.mxu1 %v3405_v47  ;;  %v3409_v55 = vpack.c.bf16 %v226_v54, %v223_v50  ;;  %v230_v56 = vld [vmem:[%s5372_s4 + $0x68] sm:$0xff]  ;;  %v229_v59 = vld [vmem:[%s5372_s4 + $0x60] sm:$0xff]  ;;  %v232_v60 = vld [vmem:[%s5372_s4 + $0x78] sm:$0xff]  ;;  %v4312_v61 = vpack.c.bf16 %v222_v52, %v219_v51  ;;  %v47_v30 = vand.u32 127, %v46_v29 }
   0xe   :  { %70 = vperm.xlu1 %4017, %v45_v16   ;;  %67 = vperm.xlu0 %4016, %v44_v17   ;;  %v3411_v58 = vpack.c.bf16 %v233_v57, %v230_v56  ;;  %v236_v62 = vld [vmem:[%s5372_s4 + $0x98] sm:$0xff]  ;;  %v239_v63 = vld [vmem:[%s5372_s4 + $0xb0] sm:$0xff]  ;;  %v3413_v0 = vpack.c.bf16 %v232_v60, %v229_v59  ;;  %v238_v3 = vld [vmem:[%s5372_s4 + $0xa8] sm:$0xff] }
   0xf   :  { %3408 = vmatprep.subr.bf16.mxu1 %v3407_v53  ;;  %v3415_v1 = vpack.c.bf16 %v239_v63, %v236_v62  ;;  %v235_v2 = vld [vmem:[%s5372_s4 + $0x90] sm:$0xff]  ;;  %v242_v4 = vld [vmem:[%s5372_s4 + $0xc8] sm:$0xff]  ;;  %v245_v5 = vld [vmem:[%s5372_s4 + $0xe0] sm:$0xff] }
  0x10   :  { %3382 = vmatpush3.bf16.msra.mxu0 %v3379_v18  ;;  %v3417_v6 = vpack.c.bf16 %v238_v3, %v235_v2  ;;  %v3419_v7 = vpack.c.bf16 %v245_v5, %v242_v4  ;;  %v241_v8 = vld [vmem:[%s5372_s4 + $0xc0] sm:$0xff]  ;;  %v244_v9 = vld [vmem:[%s5372_s4 + $0xd8] sm:$0xff]  ;;  %v251_v11 = vld [vmem:[%s5372_s4 + $0x110] sm:$0xff] }
  0x11   :  { %3384 = vmatprep.subr.bf16.mxu0 %v3383_v23  ;;  %3410 = vmatpush1.bf16.msra.mxu1 %v3409_v55  ;;  %v248_v10 = vld [vmem:[%s5372_s4 + $0xf8] sm:$0xff]  ;;  %v3421_v12 = vpack.c.bf16 %v244_v9, %v241_v8  ;;  %v247_v14 = vld [vmem:[%s5372_s4 + $0xf0] sm:$0xff]  ;;  %v250_v15 = vld [vmem:[%s5372_s4 + $0x108] sm:$0xff] }
  0x12   :  { %977 = vperm.xlu1 %4017, %v975_v21   ;;  %757 = vperm.xlu0 %4016, %v755_v22   ;;  %v3423_v13 = vpack.c.bf16 %v251_v11, %v248_v10  ;;  %v254_v16 = vld [vmem:[%s5372_s4 + $0x128] sm:$0xff]  ;;  %v257_v17 = vld [vmem:[%s5372_s4 + $0x140] sm:$0xff]  ;;  %v3425_v18 = vpack.c.bf16 %v250_v15, %v247_v14  ;;  %v256_v21 = vld [vmem:[%s5372_s4 + $0x138] sm:$0xff] }
  0x13   :  { %3412 = vmatprep.subr.bf16.mxu1 %v3411_v58  ;;  %v3427_v19 = vpack.c.bf16 %v257_v17, %v254_v16  ;;  %v253_v20 = vld [vmem:[%s5372_s4 + $0x120] sm:$0xff]  ;;  %v260_v22 = vld [vmem:[%s5372_s4 + $0x158] sm:$0xff]  ;;  %v231_v39 = vld [vmem:[%s5372_s4 + $0x70] sm:$0xff] }
  0x14   :  { %3386 = vmatpush3.bf16.msra.mxu0 %v3383_v23  ;;  %v263_v23 = vld [vmem:[%s5372_s4 + $0x170] sm:$0xff]  ;;  %v3429_v24 = vpack.c.bf16 %v256_v21, %v253_v20  ;;  %v228_v34 = vld [vmem:[%s5372_s4 + $0x58] sm:$0xff]  ;;  %v234_v40 = vld [vmem:[%s5372_s4 + $0x88] sm:$0xff] }
  0x15   :  { %3388 = vmatprep.subr.bf16.mxu0 %v3387_v28  ;;  %3414 = vmatpush1.bf16.msra.mxu1 %v3413_v0  ;;  %v3431_v25 = vpack.c.bf16 %v263_v23, %v260_v22  ;;  %v3443_v43 = vpack.c.bf16 %v234_v40, %v231_v39  ;;  %v237_v44 = vld [vmem:[%s5372_s4 + $0xa0] sm:$0xff]  ;;  %v240_v45 = vld [vmem:[%s5372_s4 + $0xb8] sm:$0xff]  ;;  %v243_v48 = vld [vmem:[%s5372_s4 + $0xd0] sm:$0xff]  ;;  %v4122_v0 = vmov 0.0  }
  0x16   :  { %1421 = vperm.xlu1 %4017, %v1419_v26   ;;  %1199 = vperm.xlu0 %4016, %v1197_v27   ;;  %v259_v26 = vld [vmem:[%s5372_s4 + $0x150] sm:$0xff]  ;;  %v262_v27 = vld [vmem:[%s5372_s4 + $0x168] sm:$0xff]  ;;  %v3447_v47 = vpack.c.bf16 %v240_v45, %v237_v44  ;;  %v249_v52 = vld [vmem:[%s5372_s4 + $0x100] sm:$0xff] }
  0x17   :  { %3416 = vmatprep.subr.bf16.mxu1 %v3415_v1  ;;  %v246_v49 = vld [vmem:[%s5372_s4 + $0xe8] sm:$0xff]  ;;  %v252_v53 = vld [vmem:[%s5372_s4 + $0x118] sm:$0xff]  ;;  %v255_v55 = vld [vmem:[%s5372_s4 + $0x130] sm:$0xff]  ;;  %346 = vmatprep.mubr.f32.mxu1 %v4122_v0  ;;  %v4123_v1 = vmov 0.0|0.0  }
  0x18   :  { %3390 = vmatpush3.bf16.msra.mxu0 %v3387_v28  ;;  %v3433_v28 = vpack.c.bf16 %v262_v27, %v259_v26  ;;  %v3451_v51 = vpack.c.bf16 %v246_v49, %v243_v48  ;;  %v3455_v54 = vpack.c.bf16 %v252_v53, %v249_v52  ;;  %v258_v56 = vld [vmem:[%s5372_s4 + $0x148] sm:$0xff]  ;;  %v261_v58 = vld [vmem:[%s5372_s4 + $0x160] sm:$0xff]  ;;  %v264_v59 = vld [vmem:[%s5372_s4 + $0x178] sm:$0xff] }
  0x19   :  { %3392 = vmatprep.subr.bf16.mxu0 %v3391_v33  ;;  %3418 = vmatpush1.bf16.msra.mxu1 %v3417_v6  ;;  %v3459_v57 = vpack.c.bf16 %v258_v56, %v255_v55  ;;  %v3463_v60 = vpack.c.bf16 %v264_v59, %v261_v58  ;;  %v549_v62 = vld [vmem:[%s5373_s5 + $0x20] sm:$0xff]  ;;  %v548_v3 = vld [vmem:[%s5373_s5 + $0x18] sm:$0xff]  ;;  %v555_v5 = vld [vmem:[%s5373_s5 + $0x50] sm:$0xff] }
  0x1a   :  { %1865 = vperm.xlu1 %4017, %v1863_v31   ;;  %1643 = vperm.xlu0 %4016, %v1641_v32   ;;  %v545_v2 = vld [vmem:[%s5373_s5] sm:$0xff]  ;;  %v552_v4 = vld [vmem:[%s5373_s5 + $0x38] sm:$0xff]  ;;  %v547_v6 = vld [vmem:[%s5373_s5 + $0x10] sm:$0xff] }
  0x1b   :  { %3420 = vmatprep.subr.bf16.mxu1 %v3419_v7  ;;  %v550_v7 = vld [vmem:[%s5373_s5 + $0x28] sm:$0xff]  ;;  %v4448_v8 = vpack.c.bf16 %v548_v3, %v545_v2  ;;  %v4450_v10 = vpack.c.bf16 %v555_v5, %v552_v4  ;;  %v551_v11 = vld [vmem:[%s5373_s5 + $0x30] sm:$0xff]  ;;  %v561_v15 = vld [vmem:[%s5373_s5 + $0x80] sm:$0xff] }
  0x1c   :  { %3394 = vmatpush3.bf16.msra.mxu0 %v3391_v33  ;;  %v225_v33 = vld [vmem:[%s5372_s4 + $0x40] sm:$0xff]  ;;  %v558_v14 = vld [vmem:[%s5373_s5 + $0x68] sm:$0xff]  ;;  %v4464_v16 = vpack.c.bf16 %v550_v7, %v547_v6  ;;  %v560_v21 = vld [vmem:[%s5373_s5 + $0x78] sm:$0xff] }
  0x1d   :  { %3396 = vmatprep.subr.bf16.mxu0 %v3395_v38  ;;  %3422 = vmatpush1.bf16.msra.mxu1 %v3421_v12  ;;  %v554_v12 = vld [vmem:[%s5373_s5 + $0x48] sm:$0xff]  ;;  %v557_v20 = vld [vmem:[%s5373_s5 + $0x60] sm:$0xff]  ;;  %v564_v23 = vld [vmem:[%s5373_s5 + $0x98] sm:$0xff] }
  0x1e   :  { %2309 = vperm.xlu1 %4017, %v2307_v36   ;;  %2087 = vperm.xlu0 %4016, %v2085_v37   ;;  %v4467_v17 = vpack.c.bf16 %v554_v12, %v551_v11  ;;  %v556_v26 = vld [vmem:[%s5373_s5 + $0x58] sm:$0xff]  ;;  %v4493_v27 = vpack.c.bf16 %v560_v21, %v557_v20  ;;  %v562_v39 = vld [vmem:[%s5373_s5 + $0x88] sm:$0xff]  ;;  %v565_v49 = vld [vmem:[%s5373_s5 + $0xa0] sm:$0xff] }
  0x1f   :  { %3424 = vmatprep.subr.bf16.mxu1 %v3423_v13  ;;  %v576_v45 = vld [vmem:[%s5373_s5 + $0xf8] sm:$0xff]  ;;  %v575_v52 = vld [vmem:[%s5373_s5 + $0xf0] sm:$0xff]  ;;  %v578_v53 = vld [vmem:[%s5373_s5 + $0x108] sm:$0xff] }
  0x20   :  { %3398 = vmatpush3.bf16.msra.mxu0 %v3395_v38  ;;  %v3439_v38 = vpack.c.bf16 %v228_v34, %v225_v33  ;;  %v570_v34 = vld [vmem:[%s5373_s5 + $0xc8] sm:$0xff]  ;;  %v585_v55 = vld [vmem:[%s5373_s5 + $0x140] sm:$0xff]  ;;  %v571_v58 = vld [vmem:[%s5373_s5 + $0xd0] sm:$0xff] }
  0x21   :  { %3400 = vmatprep.subr.bf16.mxu0 %v3399_v46  ;;  %3426 = vmatpush1.bf16.msra.mxu1 %v3425_v18  ;;  %v574_v59 = vld [vmem:[%s5373_s5 + $0xe8] sm:$0xff]  ;;  %v588_v2 = vld [vmem:[%s5373_s5 + $0x158] sm:$0xff]  ;;  %v591_v3 = vld [vmem:[%s5373_s5 + $0x170] sm:$0xff] }
  0x22   :  { %3428 = vmatprep.subr.bf16.mxu1 %v3427_v19  ;;  %v4471_v19 = vpack.c.bf16 %v561_v15, %v558_v14  ;;  %v4603_v4 = vpack.c.bf16 %v574_v59, %v571_v58  ;;  %v577_v6 = vld [vmem:[%s5373_s5 + $0x100] sm:$0xff]  ;;  %v580_v7 = vld [vmem:[%s5373_s5 + $0x118] sm:$0xff]  ;;  %v587_v11 = vld [vmem:[%s5373_s5 + $0x150] sm:$0xff] }
  0x23   :  { %v590_v12 = vld [vmem:[%s5373_s5 + $0x168] sm:$0xff]  ;;  %v583_v15 = vld [vmem:[%s5373_s5 + $0x130] sm:$0xff]  ;;  %v589_v21 = vld [vmem:[%s5373_s5 + $0x160] sm:$0xff] }
  0x24   :  { %3402 = vmatpush3.bf16.msra.mxu0 %v3399_v46  ;;  %v4630_v14 = vpack.c.bf16 %v590_v12, %v587_v11 }
  0x25   :  { %3436 = vmatprep.subr.bf16.mxu0 %v4312_v61  ;;  %3430 = vmatpush1.bf16.msra.mxu1 %v3429_v24  ;;  %v567_v24 = vld [vmem:[%s5373_s5 + $0xb0] sm:$0xff] }
  0x26   :  { %3432 = vmatprep.subr.bf16.mxu1 %v3431_v25  ;;  %v553_v25 = vld [vmem:[%s5373_s5 + $0x40] sm:$0xff] }
  0x29   :  { %3434 = vmatpush1.bf16.msra.mxu1 %v3433_v28 }
  0x81   :  { %v56_v31 = vpop.permute.xlu1 %55  ;;  %v50_v32 = vpop.permute.xlu0 %49 }
  0x82   :  { %vm72_vm8 = vcmp.eq.s32.totalorder %v47_v30, %v50_v32  ;;  %vm74_vm9 = vcmp.eq.s32.totalorder %v47_v30, %v56_v31  ;;  %v563_v31 = vld [vmem:[%s5373_s5 + $0x90] sm:$0xff]  ;;  %v566_v32 = vld [vmem:[%s5373_s5 + $0xa8] sm:$0xff] }
  0x83   :  { %2965 = vmatprep.mubr.msk.f32.mxu0 %vm72_vm8, %v4121_v35 }
  0x85   :  { %v59_v36 = vpop.permute.xlu1 %58  ;;  %v53_v37 = vpop.permute.xlu0 %52 }
  0x86   :  { %vm73_vm10 = vcmp.eq.s32.totalorder %v47_v30, %v53_v37  ;;  %vm75_vm11 = vcmp.eq.s32.totalorder %v47_v30, %v59_v36  ;;  %v4512_v36 = vpack.c.bf16 %v556_v26, %v553_v25  ;;  %v4515_v37 = vpack.c.bf16 %v566_v32, %v563_v31  ;;  %v265_v26 = vld [vmem:[%s5374_s6] sm:$0x7] }
  0x87   :  { %2966 = vmatmul.mubr.msk.f32.vlgmr.msra.gmra.mrb[0].mxu0 %vm73_vm10, %v4121_v35 }
  0x88   :  { %2968 = vmatprep.mubr.msk.f32.mxu0 %vm74_vm9, %v4121_v35  ;;  %3438 = vmatpush3.bf16.msra.mxu0 %v4312_v61  ;;  %v546_v61 = vld [vmem:[%s5373_s5 + $0x8] sm:$0xff] }
  0x89   :  { %v65_v41 = vpop.permute.xlu1 %64  ;;  %v62_v42 = vpop.permute.xlu0 %61  ;;  %3440 = vmatprep.subr.bf16.mxu0 %v3439_v38  ;;  %v4425_v63 = vpack.c.bf16 %v549_v62, %v546_v61  ;;  %v581_v61 = vld [vmem:[%s5373_s5 + $0x120] sm:$0xff]  ;;  %v584_v62 = vld [vmem:[%s5373_s5 + $0x138] sm:$0xff] }
  0x8a   :  { %vm76_vm12 = vcmp.eq.s32.totalorder %v47_v30, %v62_v42  ;;  %vm77_vm13 = vcmp.eq.s32.totalorder %v47_v30, %v65_v41  ;;  %v569_v42 = vld [vmem:[%s5373_s5 + $0xc0] sm:$0xff]  ;;  %v4607_v5 = vpack.c.bf16 %v584_v62, %v581_v61 }
  0x8b   :  { %2969 = vmatmul.mubr.msk.f32.gmra.mrb[2].mxu0 %vm75_vm11, %v4121_v35  ;;  %3468 = vmatprep.subr.bf16.mxu1 %v4425_v63 }
  0x8c   :  { %2971 = vmatprep.mubr.msk.f32.mxu0 %vm76_vm12, %v4121_v35  ;;  %3442 = vmatpush3.bf16.msra.mxu0 %v3439_v38  ;;  %v559_v38 = vld [vmem:[%s5373_s5 + $0x70] sm:$0xff] }
  0x8d   :  { %v68_v46 = vpop.permute.xlu0 %67  ;;  %3444 = vmatprep.subr.bf16.mxu0 %v3443_v43  ;;  %v71_v50 = vpop.permute.xlu1 %70 }
  0x8e   :  { %vm78_vm14 = vcmp.eq.s32.totalorder %v47_v30, %v68_v46  ;;  %vm79_vm15 = vcmp.eq.s32.totalorder %v47_v30, %v71_v50  ;;  %v4497_v30 = vpack.c.bf16 %v567_v24, %v564_v23  ;;  %v579_v46 = vld [vmem:[%s5373_s5 + $0x110] sm:$0xff]  ;;  %v568_v50 = vld [vmem:[%s5373_s5 + $0xb8] sm:$0xff]  ;;  %v268_v24 = vshrl.u32 %v46_v29, 7 }
  0x8f   :  { %2972 = vmatmul.mubr.msk.f32.gmra.mrb[4].mxu0 %vm77_vm13, %v4121_v35  ;;  %v4574_v56 = vpack.c.bf16 %v568_v50, %v565_v49  ;;  %vm2451_vm13 = vcmask 7168  }
  0x90   :  { %2974 = vmatprep.mubr.msk.f32.mxu0 %vm78_vm14, %v4121_v35  ;;  %3446 = vmatpush3.bf16.msra.mxu0 %v3443_v43  ;;  %v572_v43 = vld [vmem:[%s5373_s5 + $0xd8] sm:$0xff]  ;;  %v277_v25 = vsub.s32 2, %v268_v24  ;;  %v273_v59 = vsub.s32 1, %v268_v24 }
  0x91   :  { %3448 = vmatprep.subr.bf16.mxu0 %v3447_v47  ;;  %v4546_v48 = vpack.c.bf16 %v572_v43, %v569_v42 }
  0x93   :  { %2975 = vmatmul.mubr.msk.f32.gmra.mrb[6].mxu0 %vm79_vm15, %v4121_v35  ;;  %v573_v35 = vld [vmem:[%s5373_s5 + $0xe0] sm:$0xff] }
  0x94   :  { %3450 = vmatpush3.bf16.msra.mxu0 %v3447_v47  ;;  %v4527_v41 = vpack.c.bf16 %v573_v35, %v570_v34  ;;  %v4542_v47 = vpack.c.bf16 %v562_v39, %v559_v38 }
  0x95   :  { %3452 = vmatprep.subr.bf16.mxu0 %v3451_v51 }
  0x98   :  { %3454 = vmatpush3.bf16.msra.mxu0 %v3451_v51  ;;  %v4556_v51 = vpack.c.bf16 %v579_v46, %v576_v45 }
  0x99   :  { %3456 = vmatprep.subr.bf16.mxu0 %v3455_v54 }
  0x9c   :  { %3458 = vmatpush3.bf16.msra.mxu0 %v3455_v54  ;;  %v582_v54 = vld [vmem:[%s5373_s5 + $0x128] sm:$0xff] }
  0x9d   :  { %3460 = vmatprep.subr.bf16.mxu0 %v3459_v57 }
  0xa0   :  { %3462 = vmatpush3.bf16.msra.mxu0 %v3459_v57  ;;  %v4578_v57 = vpack.c.bf16 %v578_v53, %v575_v52  ;;  %v269_v52 = vsub.s32 0, %v268_v24  ;;  %v525_v53 = vld [vmem:[%s5375_s7] sm:$0x7] }
  0xa1   :  { %3464 = vmatprep.subr.bf16.mxu0 %v3463_v60  ;;  %v4724_v24 = vrot.slane %v525_v53, %v277_v25 }
  0xa4   :  { %3466 = vmatpush3.bf16.msra.mxu0 %v3463_v60  ;;  %v4587_v60 = vpack.c.bf16 %v585_v55, %v582_v54  ;;  %v270_v54 = vrot.slane %v265_v26, %v269_v52  ;;  %v530_v55 = vrot.slane %v525_v53, %v269_v52  ;;  %v758_v52 = vpop.permute.xlu0 %757 }
  0xa5   :  { %3499 = vmatprep.subr.bf16.mxu0 %v4123_v1  ;;  %vm759_vm1 = vcmp.eq.s32.totalorder %v758_v52, 1 }
  0xa6   :  { %v4718_v58 = vadd.f32 %v530_v55, %v270_v54 }
 0x15a   :  { %v2967_v9 = vpop.f32.mrb[0].mxu0 }
 0x15b   :  { %v178_v13 = vpop.f32.mrb[1].mxu0 }
 0x15c   :  { %347 = vmatmul.mubr.f32.vlgmr.msra.gmra.mrb[0].mxu1 %v178_v13  ;;  %3009 = vmatprep.mubr.f32.mxu0 %v178_v13  ;;  %v4626_v13 = vpack.c.bf16 %v580_v7, %v577_v6 }
 0x15d   :  { %3470 = vmatpush1.bf16.msra.mxu1 %v4448_v8  ;;  %3010 = vmatmul.mubr.f32.vlgmr.msra.gmra.mrb[8].mxu0 %v2967_v9 }
 0x15e   :  { %v2970_v18 = vpop.f32.mrb[2].mxu0  ;;  %352 = vmatprep.mubr.f32.mxu1 %v4122_v0  ;;  %3472 = vmatprep.subr.bf16.mxu1 %v4450_v10 }
 0x15f   :  { %v188_v22 = vpop.f32.mrb[3].mxu0  ;;  %3501 = vmatpush3.bf16.msra.mxu0 %v4464_v16 }
 0x160   :  { %353 = vmatmul.mubr.f32.gmra.mrb[2].mxu1 %v2967_v9  ;;  %3012 = vmatprep.mubr.f32.mxu0 %v188_v22  ;;  %v4616_v9 = vpack.c.bf16 %v591_v3, %v588_v2  ;;  %v274_v2 = vrot.slane %v265_v26, %v273_v59  ;;  %v534_v3 = vrot.slane %v525_v53, %v273_v59 }
 0x161   :  { %3474 = vmatpush1.bf16.msra.mxu1 %v4467_v17  ;;  %3013 = vmatmul.mubr.f32.gmra.mrb[10].mxu0 %v2970_v18 }
 0x162   :  { %v2973_v28 = vpop.f32.mrb[4].mxu0  ;;  %358 = vmatprep.mubr.f32.mxu1 %v4122_v0  ;;  %3476 = vmatprep.subr.bf16.mxu1 %v4471_v19  ;;  %v4721_v11 = vadd.f32 %v534_v3, %v274_v2 }
 0x163   :  { %v198_v33 = vpop.f32.mrb[5].mxu0  ;;  %3502 = vmatprep.subr.bf16.mxu0 %v4123_v1 }
 0x164   :  { %359 = vmatmul.mubr.f32.gmra.mrb[4].mxu1 %v188_v22  ;;  %3015 = vmatprep.mubr.f32.mxu0 %v198_v33  ;;  %v592_v22 = vld [vmem:[%s5373_s5 + $0x178] sm:$0xff] }
 0x165   :  { %3478 = vmatpush1.bf16.msra.mxu1 %v4493_v27  ;;  %3016 = vmatmul.mubr.f32.gmra.mrb[12].mxu0 %v2973_v28  ;;  %v4656_v23 = vpack.c.bf16 %v592_v22, %v589_v21 }
 0x166   :  { %v4523_v40 = vpop.f32.mrb[6].mxu0  ;;  %364 = vmatprep.mubr.f32.mxu1 %v4122_v0  ;;  %3480 = vmatprep.subr.bf16.mxu1 %v4497_v30 }
 0x167   :  { %v208_v44 = vpop.f32.mrb[7].mxu0  ;;  %3504 = vmatpush3.bf16.msra.mxu0 %v4512_v36 }
 0x168   :  { %365 = vmatmul.mubr.f32.gmra.mrb[6].mxu1 %v2970_v18  ;;  %3018 = vmatprep.mubr.f32.mxu0 %v208_v44  ;;  %v586_v18 = vld [vmem:[%s5373_s5 + $0x148] sm:$0xff] }
 0x169   :  { %3482 = vmatpush1.bf16.msra.mxu1 %v4515_v37  ;;  %3019 = vmatmul.mubr.f32.gmra.mrb[14].mxu0 %v4523_v40  ;;  %v4642_v20 = vpack.c.bf16 %v586_v18, %v583_v15 }
 0x16a   :  { %370 = vmatprep.mubr.f32.mxu1 %v4122_v0  ;;  %3484 = vmatprep.subr.bf16.mxu1 %v4527_v41 }
 0x16b   :  { %3505 = vmatprep.subr.bf16.mxu0 %v4123_v1  ;;  %3053 = vmatprep.mubr.msk.f32.mxu0 %vm4124_vm0, %v4122_v0 }
 0x16c   :  { %371 = vmatmul.mubr.f32.gmra.mrb[8].mxu1 %v198_v33  ;;  %3507 = vmatpush3.bf16.msra.mxu0 %v4542_v47 }
 0x16d   :  { %3486 = vmatpush1.bf16.msra.mxu1 %v4546_v48  ;;  %376 = vmatprep.mubr.f32.mxu1 %v4122_v0 }
 0x16e   :  { %3488 = vmatprep.subr.bf16.mxu1 %v4556_v51  ;;  %3508 = vmatprep.subr.bf16.mxu0 %v4123_v1 }
 0x170   :  { %377 = vmatmul.mubr.f32.gmra.mrb[10].mxu1 %v2973_v28  ;;  %3510 = vmatpush3.bf16.msra.mxu0 %v4574_v56  ;;  %v278_v28 = vrot.slane %v265_v26, %v277_v25 }
 0x171   :  { %3490 = vmatpush1.bf16.msra.mxu1 %v4578_v57  ;;  %382 = vmatprep.mubr.f32.mxu1 %v4122_v0 }
 0x172   :  { %3492 = vmatprep.subr.bf16.mxu1 %v4587_v60  ;;  %3511 = vmatprep.subr.bf16.mxu0 %v4123_v1 }
 0x174   :  { %383 = vmatmul.mubr.f32.gmra.mrb[12].mxu1 %v208_v44  ;;  %3513 = vmatpush3.bf16.msra.mxu0 %v4603_v4 }
 0x175   :  { %3494 = vmatpush1.bf16.msra.mxu1 %v4607_v5  ;;  %388 = vmatprep.mubr.f32.mxu1 %v4122_v0 }
 0x176   :  { %3496 = vmatprep.subr.bf16.mxu1 %v4616_v9  ;;  %3514 = vmatprep.subr.bf16.mxu0 %v4123_v1 }
 0x178   :  { %389 = vmatmul.mubr.f32.gmra.mrb[14].mxu1 %v4523_v40  ;;  %3516 = vmatpush3.bf16.msra.mxu0 %v4626_v13 }
 0x179   :  { %3498 = vmatpush1.bf16.msra.mxu1 %v4630_v14  ;;  %657 = vmatprep.mubr.f32.mxu1 %v4122_v0 }
 0x17a   :  { %3517 = vmatprep.subr.bf16.mxu0 %v4123_v1  ;;  %3524 = vmatprep.subr.bf16.mxu1 %v4425_v63 }
 0x17c   :  { %658 = vmatmul.mubr.f32.vlgmr.msra.gmra.mrb[0].mxu1 %v4122_v0  ;;  %3519 = vmatpush3.bf16.msra.mxu0 %v4642_v20 }
 0x17d   :  { %3520 = vmatprep.subr.bf16.mxu0 %v4123_v1  ;;  %3526 = vmatpush1.bf16.msra.mxu1 %v4448_v8 }
 0x17e   :  { %3528 = vmatprep.subr.bf16.mxu1 %v4450_v10  ;;  %877 = vmatprep.mubr.f32.mxu1 %v4122_v0 }
 0x180   :  { %3522 = vmatpush3.bf16.msra.mxu0 %v4656_v23 }
 0x181   :  { %3555 = vmatprep.subr.bf16.mxu0 %v4123_v1  ;;  %3530 = vmatpush1.bf16.msra.mxu1 %v4467_v17 }
 0x182   :  { %3532 = vmatprep.subr.bf16.mxu1 %v4471_v19 }
 0x183   :  { %3054 = vmatmul.mubr.f32.vlgmr.msra.gmra.mrb[16].mxu0 %v4122_v0 }
 0x184   :  { %3557 = vmatpush3.bf16.msra.mxu0 %v4464_v16  ;;  %3088 = vmatprep.mubr.msk.f32.mxu0 %vm4124_vm0, %v4122_v0 }
 0x185   :  { %3558 = vmatprep.subr.bf16.mxu0 %v4123_v1  ;;  %3534 = vmatpush1.bf16.msra.mxu1 %v4493_v27 }
 0x186   :  { %3536 = vmatprep.subr.bf16.mxu1 %v4497_v30 }
 0x188   :  { %3560 = vmatpush3.bf16.msra.mxu0 %v4512_v36 }
 0x189   :  { %3561 = vmatprep.subr.bf16.mxu0 %v4123_v1  ;;  %3538 = vmatpush1.bf16.msra.mxu1 %v4515_v37 }
 0x18a   :  { %3540 = vmatprep.subr.bf16.mxu1 %v4527_v41 }
 0x18c   :  { %3563 = vmatpush3.bf16.msra.mxu0 %v4542_v47 }
 0x18d   :  { %3564 = vmatprep.subr.bf16.mxu0 %v4123_v1  ;;  %3542 = vmatpush1.bf16.msra.mxu1 %v4546_v48 }
 0x18e   :  { %3544 = vmatprep.subr.bf16.mxu1 %v4556_v51 }
 0x190   :  { %3566 = vmatpush3.bf16.msra.mxu0 %v4574_v56 }
 0x191   :  { %3567 = vmatprep.subr.bf16.mxu0 %v4123_v1  ;;  %3546 = vmatpush1.bf16.msra.mxu1 %v4578_v57 }
 0x192   :  { %3548 = vmatprep.subr.bf16.mxu1 %v4587_v60 }
 0x194   :  { %3569 = vmatpush3.bf16.msra.mxu0 %v4603_v4 }
 0x195   :  { %3570 = vmatprep.subr.bf16.mxu0 %v4123_v1  ;;  %3550 = vmatpush1.bf16.msra.mxu1 %v4607_v5 }
 0x196   :  { %3552 = vmatprep.subr.bf16.mxu1 %v4616_v9 }
 0x198   :  { %3572 = vmatpush3.bf16.msra.mxu0 %v4626_v13 }
 0x199   :  { %3573 = vmatprep.subr.bf16.mxu0 %v4123_v1  ;;  %3554 = vmatpush1.bf16.msra.mxu1 %v4630_v14 }
 0x19a   :  { %3580 = vmatprep.subr.bf16.mxu1 %v4425_v63 }
 0x19c   :  { %3575 = vmatpush3.bf16.msra.mxu0 %v4642_v20 }
 0x19d   :  { %3576 = vmatprep.subr.bf16.mxu0 %v4123_v1 }
 0x1a0   :  { %3578 = vmatpush3.bf16.msra.mxu0 %v4656_v23 }
 0x1a1   :  { %3611 = vmatprep.subr.bf16.mxu0 %v4123_v1 }
 0x230   :  { %v3011_v31 = vpop.f32.mrb[8].mxu0 }
 0x231   :  { %v4701_v32 = vadd.f32 %v3011_v31, %v278_v28  ;;  %v461_v33 = vpop.f32.mrb[9].mxu0 }
 0x232   :  { %v462_v34 = vadd.f32 %v461_v33, %v278_v28 }
 0x234   :  { %v3014_v35 = vpop.f32.mrb[10].mxu0 }
 0x235   :  { %v4703_v38 = vadd.f32 %v3014_v35, %v278_v28  ;;  %v471_v39 = vpop.f32.mrb[11].mxu0 }
 0x236   :  { %v4705_v40 = vadd.f32 %v471_v39, %v278_v28 }
 0x238   :  { %v3017_v42 = vpop.f32.mrb[12].mxu0 }
 0x239   :  { %v4707_v43 = vadd.f32 %v3017_v42, %v278_v28  ;;  %v481_v29 = vpop.f32.mrb[13].mxu0 }
 0x23a   :  { %v4709_v44 = vadd.f32 %v481_v29, %v278_v28 }
 0x23c   :  { %v3020_v45 = vpop.f32.mrb[14].mxu0 }
 0x23d   :  { %v4711_v46 = vadd.f32 %v3020_v45, %v278_v28  ;;  %v491_v49 = vpop.f32.mrb[15].mxu0 }
 0x23e   :  { %v4713_v50 = vadd.f32 %v491_v49, %v278_v28 }
 0x24f   :  { %v659_v61 = vpop.f32.mrb[0].mxu1 }
 0x250   :  { %v3964_v62 = vadd.f32 %v4718_v58, %v659_v61  ;;  %v661_v6 = vpop.f32.mrb[1].mxu1 }
 0x251   :  { %v3966_v18 = vadd.f32 %v4721_v11, %v661_v6 }
 0x252   :  { %v2696_v7 = vmul.f32 -1.442695, %v3964_v62 }
 0x253   :  { %v2697_v21 = vmul.f32 -1.442695, %v3966_v18 }
 0x254   :  { %4018 = vpow2.f32 %v2696_v7 }
 0x255   :  { %4020 = vpow2.f32 %v2697_v21 }
 0x256   :  { %v730_v12 = vpop.f32.mrb[16].mxu0 }
 0x257   :  { %v3055_v15 = vpop.f32.mrb[17].mxu0  ;;  %v731_v31 = vadd.f32 %v730_v12, %v4724_v24 }
 0x25e   :  { %v4019_v22 = vpop.eup %4018 }
 0x25f   :  { %v738_v28 = vadd.f32 1.0, %v4019_v22  ;;  %v4021_v26 = vpop.eup %4020 }
 0x260   :  { %v745_v39 = vadd.f32 1.0, %v4021_v26 }
 0x261   :  { %4022 = vrcp.f32 %v738_v28 }
 0x26b   :  { %v4023_v33 = vpop.eup %4022 }
 0x26c   :  { %v748_v35 = vmul.f32 %v4023_v33, %v731_v31 }
 0x26e   :  { %v749_v42 = vadd.f32 %v748_v35, %v462_v34  ;;  %v978_v35 = vpop.permute.xlu1 %977 }
 0x26f   :  { %vm979_vm2 = vcmp.eq.s32.totalorder %v978_v35, 1 }
 0x270   :  { %4024 = vtanh.f32 %v749_v42 }
 0x271   :  { %4026 = vrcp.f32 %v745_v39 }
 0x27a   :  { %v4025_v29 = vpop.eup %4024 }
 0x27b   :  { %v751_v45 = vsub.f32 0.0, %v4025_v29  ;;  %v4027_v49 = vpop.eup %4026 }
 0x27d   :  { %v752_v54 = vmul.f32 %v4027_v49, %v751_v45 }
 0x27f   :  { %v753_v55 = vadd.f32 %v4025_v29, %v752_v54 }
 0x281   :  { %2698 = vmatmul.mubr.msk.f32.vlgmr.msra.gmra.mrb[2].mxu1 %vm759_vm1, %v753_v55  ;;  %3089 = vmatmul.mubr.msk.f32.vlgmr.msra.gmra.mrb[18].mxu0 %vm759_vm1, %v753_v55  ;;  %v4727_v25 = vsel %vm759_vm1, %v753_v55, 0.0 }
 0x282   :  { %3582 = vmatpush1.bf16.msra.mxu1 %v4448_v8  ;;  %3613 = vmatpush3.bf16.msra.mxu0 %v4464_v16 }
 0x283   :  { %3584 = vmatprep.subr.bf16.mxu1 %v4450_v10  ;;  %3614 = vmatprep.subr.bf16.mxu0 %v4123_v1 }
 0x284   :  { %1099 = vmatprep.mubr.f32.mxu1 %v4122_v0  ;;  %3123 = vmatprep.mubr.msk.f32.mxu0 %vm4124_vm0, %v4122_v0 }
 0x286   :  { %3586 = vmatpush1.bf16.msra.mxu1 %v4467_v17  ;;  %3616 = vmatpush3.bf16.msra.mxu0 %v4512_v36 }
 0x287   :  { %3588 = vmatprep.subr.bf16.mxu1 %v4471_v19  ;;  %3617 = vmatprep.subr.bf16.mxu0 %v4123_v1 }
 0x28a   :  { %3590 = vmatpush1.bf16.msra.mxu1 %v4493_v27  ;;  %3619 = vmatpush3.bf16.msra.mxu0 %v4542_v47 }
 0x28b   :  { %3592 = vmatprep.subr.bf16.mxu1 %v4497_v30  ;;  %3620 = vmatprep.subr.bf16.mxu0 %v4123_v1 }
 0x28e   :  { %3594 = vmatpush1.bf16.msra.mxu1 %v4515_v37  ;;  %3622 = vmatpush3.bf16.msra.mxu0 %v4574_v56 }
 0x28f   :  { %3596 = vmatprep.subr.bf16.mxu1 %v4527_v41  ;;  %3623 = vmatprep.subr.bf16.mxu0 %v4123_v1 }
 0x292   :  { %3598 = vmatpush1.bf16.msra.mxu1 %v4546_v48  ;;  %3625 = vmatpush3.bf16.msra.mxu0 %v4603_v4 }
 0x293   :  { %3600 = vmatprep.subr.bf16.mxu1 %v4556_v51  ;;  %3626 = vmatprep.subr.bf16.mxu0 %v4123_v1 }
 0x296   :  { %3602 = vmatpush1.bf16.msra.mxu1 %v4578_v57  ;;  %3628 = vmatpush3.bf16.msra.mxu0 %v4626_v13 }
 0x297   :  { %3604 = vmatprep.subr.bf16.mxu1 %v4587_v60  ;;  %3629 = vmatprep.subr.bf16.mxu0 %v4123_v1 }
 0x29a   :  { %3606 = vmatpush1.bf16.msra.mxu1 %v4607_v5  ;;  %3631 = vmatpush3.bf16.msra.mxu0 %v4642_v20 }
 0x29b   :  { %3608 = vmatprep.subr.bf16.mxu1 %v4616_v9  ;;  %3632 = vmatprep.subr.bf16.mxu0 %v4123_v1 }
 0x29e   :  { %3610 = vmatpush1.bf16.msra.mxu1 %v4630_v14  ;;  %3634 = vmatpush3.bf16.msra.mxu0 %v4656_v23 }
 0x29f   :  { %3636 = vmatprep.subr.bf16.mxu1 %v4425_v63  ;;  %3667 = vmatprep.subr.bf16.mxu0 %v4123_v1 }
 0x354   :  { %v879_v34 = vpop.f32.mrb[2].mxu1  ;;  %v950_v53 = vpop.f32.mrb[18].mxu0 }
 0x355   :  { %v3968_v59 = vadd.f32 %v4718_v58, %v879_v34  ;;  %v881_v61 = vpop.f32.mrb[3].mxu1  ;;  %v3090_v62 = vpop.f32.mrb[19].mxu0  ;;  %v951_v63 = vadd.f32 %v950_v53, %v4724_v24  ;;  %v1438_v53 = vld [vmem:[%s5373_s5 + $0x38] sm:$0xff] }
 0x356   :  { %v3970_v3 = vadd.f32 %v4721_v11, %v881_v61  ;;  %v1437_v62 = vld [vmem:[%s5373_s5 + $0x30] sm:$0xff] }
 0x357   :  { %v2700_v2 = vmul.f32 -1.442695, %v3968_v59  ;;  %v1441_v59 = vld [vmem:[%s5373_s5 + $0x50] sm:$0xff] }
 0x358   :  { %v2701_v6 = vmul.f32 -1.442695, %v3970_v3  ;;  %v4855_v61 = vpack.c.bf16 %v1441_v59, %v1438_v53 }
 0x359   :  { %4028 = vpow2.f32 %v2700_v2  ;;  %v1440_v2 = vld [vmem:[%s5373_s5 + $0x48] sm:$0xff] }
 0x35a   :  { %4030 = vpow2.f32 %v2701_v6  ;;  %v4863_v3 = vpack.c.bf16 %v1440_v2, %v1437_v62  ;;  %v1444_v6 = vld [vmem:[%s5373_s5 + $0x68] sm:$0xff]  ;;  %v1473_v2 = vld [vmem:[%s5373_s5 + $0x150] sm:$0xff] }
 0x363   :  { %v4029_v7 = vpop.eup %4028 }
 0x364   :  { %v958_v12 = vadd.f32 1.0, %v4029_v7  ;;  %v4031_v15 = vpop.eup %4030  ;;  %v1447_v7 = vld [vmem:[%s5373_s5 + $0x80] sm:$0xff] }
 0x365   :  { %v965_v28 = vadd.f32 1.0, %v4031_v15  ;;  %v1443_v15 = vld [vmem:[%s5373_s5 + $0x60] sm:$0xff] }
 0x366   :  { %4032 = vrcp.f32 %v958_v12  ;;  %v4873_v12 = vpack.c.bf16 %v1447_v7, %v1444_v6  ;;  %v1476_v6 = vld [vmem:[%s5373_s5 + $0x168] sm:$0xff]  ;;  %v1475_v7 = vld [vmem:[%s5373_s5 + $0x160] sm:$0xff] }
 0x370   :  { %v4033_v18 = vpop.eup %4032 }
 0x371   :  { %v968_v21 = vmul.f32 %v4033_v18, %v951_v63  ;;  %v1446_v63 = vld [vmem:[%s5373_s5 + $0x78] sm:$0xff] }
 0x372   :  { %v4881_v18 = vpack.c.bf16 %v1446_v63, %v1443_v15  ;;  %v1478_v15 = vld [vmem:[%s5373_s5 + $0x178] sm:$0xff]  ;;  %v5015_v63 = vpack.c.bf16 %v1476_v6, %v1473_v2  ;;  %v1661_v2 = vld [vmem:[%s5373_s5 + $0x40] sm:$0xff] }
 0x373   :  { %v969_v22 = vadd.f32 %v968_v21, %v4701_v32  ;;  %v1450_v21 = vld [vmem:[%s5373_s5 + $0x98] sm:$0xff] }
 0x374   :  { %v1664_v6 = vld [vmem:[%s5373_s5 + $0x58] sm:$0xff] }
 0x375   :  { %4034 = vtanh.f32 %v969_v22  ;;  %v1453_v22 = vld [vmem:[%s5373_s5 + $0xb0] sm:$0xff] }
 0x376   :  { %4036 = vrcp.f32 %v965_v28  ;;  %v4891_v28 = vpack.c.bf16 %v1453_v22, %v1450_v21  ;;  %v5019_v21 = vpack.c.bf16 %v1478_v15, %v1475_v7  ;;  %v5073_v7 = vpack.c.bf16 %v1664_v6, %v1661_v2  ;;  %v1667_v15 = vld [vmem:[%s5373_s5 + $0x70] sm:$0xff] }
 0x37f   :  { %v4035_v31 = vpop.eup %4034 }
 0x380   :  { %v971_v26 = vsub.f32 %v4727_v25, %v4035_v31  ;;  %v4037_v33 = vpop.eup %4036 }
 0x382   :  { %v972_v39 = vmul.f32 %v4037_v33, %v971_v26  ;;  %v1452_v26 = vld [vmem:[%s5373_s5 + $0xa8] sm:$0xff]  ;;  %v1451_v33 = vld [vmem:[%s5373_s5 + $0xa0] sm:$0xff] }
 0x384   :  { %v973_v42 = vadd.f32 %v4035_v31, %v972_v39  ;;  %v1449_v31 = vld [vmem:[%s5373_s5 + $0x90] sm:$0xff]  ;;  %v1454_v39 = vld [vmem:[%s5373_s5 + $0xb8] sm:$0xff] }
 0x385   :  { %v4902_v35 = vpack.c.bf16 %v1452_v26, %v1449_v31 }
 0x386   :  { %v4770_v29 = vsel %vm979_vm2, %v973_v42, %v4727_v25  ;;  %v4772_v45 = vsel %vm979_vm2, %v973_v42, 0.0  ;;  %v4908_v42 = vpack.c.bf16 %v1454_v39, %v1451_v33  ;;  %vm2663_vm2 = vcmask 15360  }
 0x387   :  { %1100 = vmatmul.mubr.f32.vlgmr.msra.gmra.mrb[4].mxu1 %v4770_v29  ;;  %3124 = vmatmul.mubr.f32.vlgmr.msra.gmra.mrb[20].mxu0 %v4770_v29 }
 0x388   :  { %3638 = vmatpush1.bf16.msra.mxu1 %v4448_v8  ;;  %3669 = vmatpush3.bf16.msra.mxu0 %v4464_v16 }
 0x389   :  { %3640 = vmatprep.subr.bf16.mxu1 %v4450_v10  ;;  %3670 = vmatprep.subr.bf16.mxu0 %v4123_v1 }
 0x38a   :  { %1321 = vmatprep.mubr.f32.mxu1 %v4122_v0  ;;  %3158 = vmatprep.mubr.msk.f32.mxu0 %vm4124_vm0, %v4122_v0 }
 0x38c   :  { %3642 = vmatpush1.bf16.msra.mxu1 %v4467_v17  ;;  %3672 = vmatpush3.bf16.msra.mxu0 %v4512_v36 }
 0x38d   :  { %3644 = vmatprep.subr.bf16.mxu1 %v4471_v19  ;;  %3673 = vmatprep.subr.bf16.mxu0 %v4123_v1 }
 0x390   :  { %3646 = vmatpush1.bf16.msra.mxu1 %v4493_v27  ;;  %3675 = vmatpush3.bf16.msra.mxu0 %v4542_v47 }
 0x391   :  { %3648 = vmatprep.subr.bf16.mxu1 %v4497_v30  ;;  %3676 = vmatprep.subr.bf16.mxu0 %v4123_v1 }
 0x394   :  { %3650 = vmatpush1.bf16.msra.mxu1 %v4515_v37  ;;  %3678 = vmatpush3.bf16.msra.mxu0 %v4574_v56 }
 0x395   :  { %3652 = vmatprep.subr.bf16.mxu1 %v4527_v41  ;;  %3679 = vmatprep.subr.bf16.mxu0 %v4123_v1 }
 0x398   :  { %3654 = vmatpush1.bf16.msra.mxu1 %v4546_v48  ;;  %3681 = vmatpush3.bf16.msra.mxu0 %v4603_v4 }
 0x399   :  { %3656 = vmatprep.subr.bf16.mxu1 %v4556_v51  ;;  %3682 = vmatprep.subr.bf16.mxu0 %v4123_v1 }
 0x39c   :  { %3658 = vmatpush1.bf16.msra.mxu1 %v4578_v57  ;;  %3684 = vmatpush3.bf16.msra.mxu0 %v4626_v13 }
 0x39d   :  { %3660 = vmatprep.subr.bf16.mxu1 %v4587_v60  ;;  %3685 = vmatprep.subr.bf16.mxu0 %v4123_v1 }
 0x3a0   :  { %3662 = vmatpush1.bf16.msra.mxu1 %v4607_v5  ;;  %3687 = vmatpush3.bf16.msra.mxu0 %v4642_v20 }
 0x3a1   :  { %3664 = vmatprep.subr.bf16.mxu1 %v4616_v9  ;;  %3688 = vmatprep.subr.bf16.mxu0 %v4123_v1 }
 0x3a4   :  { %3666 = vmatpush1.bf16.msra.mxu1 %v4630_v14  ;;  %3690 = vmatpush3.bf16.msra.mxu0 %v4656_v23  ;;  %v1200_v23 = vpop.permute.xlu0 %1199 }
 0x3a5   :  { %3723 = vmatprep.subr.bf16.mxu0 %v4123_v1  ;;  %vm1201_vm3 = vcmp.eq.s32.totalorder %v1200_v23, 1 }
 0x45a   :  { %v1101_v8 = vpop.f32.mrb[4].mxu1  ;;  %v1172_v10 = vpop.f32.mrb[20].mxu0 }
 0x45b   :  { %v3972_v17 = vadd.f32 %v4718_v58, %v1101_v8  ;;  %v1103_v19 = vpop.f32.mrb[5].mxu1  ;;  %v3125_v27 = vpop.f32.mrb[21].mxu0  ;;  %v1173_v57 = vadd.f32 %v1172_v10, %v4724_v24  ;;  %v1459_v8 = vld [vmem:[%s5373_s5 + $0xe0] sm:$0xff] }
 0x45c   :  { %v3974_v37 = vadd.f32 %v4721_v11, %v1103_v19  ;;  %v1458_v19 = vld [vmem:[%s5373_s5 + $0xd8] sm:$0xff]  ;;  %v1457_v27 = vld [vmem:[%s5373_s5 + $0xd0] sm:$0xff] }
 0x45d   :  { %v2702_v30 = vmul.f32 -1.442695, %v3972_v17  ;;  %v1455_v17 = vld [vmem:[%s5373_s5 + $0xc0] sm:$0xff] }
 0x45e   :  { %v2703_v41 = vmul.f32 -1.442695, %v3974_v37  ;;  %v1460_v37 = vld [vmem:[%s5373_s5 + $0xe8] sm:$0xff] }
 0x45f   :  { %4038 = vpow2.f32 %v2702_v30  ;;  %v4930_v30 = vpack.c.bf16 %v1458_v19, %v1455_v17 }
 0x460   :  { %4040 = vpow2.f32 %v2703_v41  ;;  %v1462_v41 = vld [vmem:[%s5373_s5 + $0xf8] sm:$0xff] }
 0x469   :  { %v4039_v48 = vpop.eup %4038 }
 0x46a   :  { %v1180_v51 = vadd.f32 1.0, %v4039_v48  ;;  %v4041_v56 = vpop.eup %4040  ;;  %v1465_v48 = vld [vmem:[%s5373_s5 + $0x110] sm:$0xff] }
 0x46b   :  { %v1187_v9 = vadd.f32 1.0, %v4041_v56  ;;  %v4944_v56 = vpack.c.bf16 %v1465_v48, %v1462_v41 }
 0x46c   :  { %4042 = vrcp.f32 %v1180_v51  ;;  %v4942_v51 = vpack.c.bf16 %v1460_v37, %v1457_v27 }
 0x476   :  { %v4043_v60 = vpop.eup %4042 }
 0x477   :  { %v1190_v4 = vmul.f32 %v4043_v60, %v1173_v57  ;;  %v1461_v57 = vld [vmem:[%s5373_s5 + $0xf0] sm:$0xff]  ;;  %v1464_v60 = vld [vmem:[%s5373_s5 + $0x108] sm:$0xff] }
 0x479   :  { %v1191_v5 = vadd.f32 %v1190_v4, %v4705_v40  ;;  %v1432_v40 = vld [vmem:[%s5373_s5 + $0x8] sm:$0xff]  ;;  %v1463_v4 = vld [vmem:[%s5373_s5 + $0x100] sm:$0xff] }
 0x47b   :  { %4044 = vtanh.f32 %v1191_v5  ;;  %v4956_v5 = vpack.c.bf16 %v1464_v60, %v1461_v57 }
 0x47c   :  { %4046 = vrcp.f32 %v1187_v9  ;;  %v1466_v9 = vld [vmem:[%s5373_s5 + $0x118] sm:$0xff] }
 0x485   :  { %v4045_v13 = vpop.eup %4044 }
 0x486   :  { %v1193_v14 = vsub.f32 %v4770_v29, %v4045_v13  ;;  %v4047_v20 = vpop.eup %4046 }
 0x488   :  { %v1194_v32 = vmul.f32 %v4047_v20, %v1193_v14  ;;  %v1471_v14 = vld [vmem:[%s5373_s5 + $0x140] sm:$0xff]  ;;  %v4969_v20 = vpack.c.bf16 %v1466_v9, %v1463_v4 }
 0x48a   :  { %v1195_v49 = vadd.f32 %v4045_v13, %v1194_v32  ;;  %v1468_v13 = vld [vmem:[%s5373_s5 + $0x128] sm:$0xff]  ;;  %v1467_v32 = vld [vmem:[%s5373_s5 + $0x120] sm:$0xff] }
 0x48b   :  { %v4971_v23 = vpack.c.bf16 %v1471_v14, %v1468_v13 }
 0x48c   :  { %v4816_v52 = vsel %vm1201_vm3, %v1195_v49, %v4770_v29  ;;  %v4818_v54 = vsel %vm1201_vm3, %v1195_v49, 0.0  ;;  %v1456_v29 = vld [vmem:[%s5373_s5 + $0xc8] sm:$0xff]  ;;  %v1470_v49 = vld [vmem:[%s5373_s5 + $0x138] sm:$0xff] }
 0x48d   :  { %1322 = vmatmul.mubr.f32.vlgmr.msra.gmra.mrb[6].mxu1 %v4816_v52  ;;  %3159 = vmatmul.mubr.f32.vlgmr.msra.gmra.mrb[22].mxu0 %v4816_v52  ;;  %v4918_v10 = vpack.c.bf16 %v1459_v8, %v1456_v29  ;;  %v4993_v53 = vpack.c.bf16 %v1470_v49, %v1467_v32  ;;  %v1422_v32 = vpop.permute.xlu1 %1421 }
 0x48e   :  { %3725 = vmatpush3.bf16.msra.mxu0 %v4464_v16  ;;  %1543 = vmatprep.mubr.f32.mxu1 %v4122_v0  ;;  %v1435_v16 = vld [vmem:[%s5373_s5 + $0x20] sm:$0xff]  ;;  %vm1423_vm4 = vcmp.eq.s32.totalorder %v1422_v32, 1 }
 0x48f   :  { %3726 = vmatprep.subr.bf16.mxu0 %v4123_v1  ;;  %3193 = vmatprep.mubr.msk.f32.mxu0 %vm4124_vm0, %v4122_v0  ;;  %v4837_v55 = vpack.c.bf16 %v1435_v16, %v1432_v40  ;;  %v1469_v40 = vld [vmem:[%s5373_s5 + $0x130] sm:$0xff]  ;;  %v1472_v16 = vld [vmem:[%s5373_s5 + $0x148] sm:$0xff] }
 0x490   :  { %v4997_v59 = vpack.c.bf16 %v1472_v16, %v1469_v40 }
 0x491   :  { %3692 = vmatprep.subr.bf16.mxu1 %v4837_v55 }
 0x492   :  { %3728 = vmatpush3.bf16.msra.mxu0 %v4512_v36  ;;  %v1431_v36 = vld [vmem:[%s5373_s5] sm:$0xff] }
 0x493   :  { %3729 = vmatprep.subr.bf16.mxu0 %v4123_v1 }
 0x496   :  { %3731 = vmatpush3.bf16.msra.mxu0 %v4542_v47  ;;  %v1434_v47 = vld [vmem:[%s5373_s5 + $0x18] sm:$0xff] }
 0x497   :  { %3732 = vmatprep.subr.bf16.mxu0 %v4123_v1  ;;  %v4845_v34 = vpack.c.bf16 %v1434_v47, %v1431_v36  ;;  %v1474_v36 = vld [vmem:[%s5373_s5 + $0x158] sm:$0xff]  ;;  %v1477_v47 = vld [vmem:[%s5373_s5 + $0x170] sm:$0xff] }
 0x498   :  { %v4999_v62 = vpack.c.bf16 %v1477_v47, %v1474_v36 }
 0x499   :  { %3694 = vmatpush1.bf16.msra.mxu1 %v4845_v34 }
 0x49a   :  { %3696 = vmatprep.subr.bf16.mxu1 %v4855_v61  ;;  %3734 = vmatpush3.bf16.msra.mxu0 %v4908_v42 }
 0x49b   :  { %3735 = vmatprep.subr.bf16.mxu0 %v4123_v1 }
 0x49d   :  { %3698 = vmatpush1.bf16.msra.mxu1 %v4863_v3 }
 0x49e   :  { %3700 = vmatprep.subr.bf16.mxu1 %v4873_v12  ;;  %3737 = vmatpush3.bf16.msra.mxu0 %v4942_v51 }
 0x49f   :  { %3738 = vmatprep.subr.bf16.mxu0 %v4123_v1 }
 0x4a1   :  { %3702 = vmatpush1.bf16.msra.mxu1 %v4881_v18 }
 0x4a2   :  { %3704 = vmatprep.subr.bf16.mxu1 %v4891_v28  ;;  %3740 = vmatpush3.bf16.msra.mxu0 %v4969_v20 }
 0x4a3   :  { %3741 = vmatprep.subr.bf16.mxu0 %v4123_v1 }
 0x4a5   :  { %3706 = vmatpush1.bf16.msra.mxu1 %v4902_v35 }
 0x4a6   :  { %3708 = vmatprep.subr.bf16.mxu1 %v4918_v10  ;;  %3743 = vmatpush3.bf16.msra.mxu0 %v4997_v59 }
 0x4a7   :  { %3744 = vmatprep.subr.bf16.mxu0 %v4123_v1 }
 0x4a9   :  { %3710 = vmatpush1.bf16.msra.mxu1 %v4930_v30 }
 0x4aa   :  { %3712 = vmatprep.subr.bf16.mxu1 %v4944_v56  ;;  %3746 = vmatpush3.bf16.msra.mxu0 %v5019_v21 }
 0x4ab   :  { %3779 = vmatprep.subr.bf16.mxu0 %v4123_v1 }
 0x4ad   :  { %3714 = vmatpush1.bf16.msra.mxu1 %v4956_v5 }
 0x4ae   :  { %3716 = vmatprep.subr.bf16.mxu1 %v4971_v23 }
 0x4b1   :  { %3718 = vmatpush1.bf16.msra.mxu1 %v4993_v53 }
 0x4b2   :  { %3720 = vmatprep.subr.bf16.mxu1 %v4999_v62 }
 0x4b5   :  { %3722 = vmatpush1.bf16.msra.mxu1 %v5015_v63 }
 0x4b6   :  { %3748 = vmatprep.subr.bf16.mxu1 %v4837_v55 }
 0x560   :  { %v1323_v22 = vpop.f32.mrb[6].mxu1  ;;  %v1394_v31 = vpop.f32.mrb[22].mxu0 }
 0x561   :  { %v3976_v26 = vadd.f32 %v4718_v58, %v1323_v22  ;;  %v1325_v33 = vpop.f32.mrb[7].mxu1  ;;  %v3160_v39 = vpop.f32.mrb[23].mxu0  ;;  %v1395_v41 = vadd.f32 %v1394_v31, %v4724_v24  ;;  %v1670_v22 = vld [vmem:[%s5373_s5 + $0x88] sm:$0xff] }
 0x562   :  { %v3978_v8 = vadd.f32 %v4721_v11, %v1325_v33  ;;  %v5083_v31 = vpack.c.bf16 %v1670_v22, %v1667_v15 }
 0x563   :  { %v2704_v29 = vmul.f32 -1.442695, %v3976_v26 }
 0x564   :  { %v2705_v17 = vmul.f32 -1.442695, %v3978_v8 }
 0x565   :  { %4048 = vpow2.f32 %v2704_v29 }
 0x566   :  { %4050 = vpow2.f32 %v2705_v17 }
 0x56f   :  { %v4049_v19 = vpop.eup %4048 }
 0x570   :  { %v1402_v27 = vadd.f32 1.0, %v4049_v19  ;;  %v4051_v37 = vpop.eup %4050 }
 0x571   :  { %v1409_v4 = vadd.f32 1.0, %v4051_v37 }
 0x572   :  { %4052 = vrcp.f32 %v1402_v27 }
 0x57c   :  { %v4053_v48 = vpop.eup %4052 }
 0x57d   :  { %v1412_v57 = vmul.f32 %v4053_v48, %v1395_v41 }
 0x57f   :  { %v1413_v60 = vadd.f32 %v1412_v57, %v4703_v38  ;;  %v1655_v38 = vld [vmem:[%s5373_s5 + $0x10] sm:$0xff] }
 0x581   :  { %4054 = vtanh.f32 %v1413_v60 }
 0x582   :  { %4056 = vrcp.f32 %v1409_v4 }
 0x58b   :  { %v4055_v9 = vpop.eup %4054 }
 0x58c   :  { %v1415_v13 = vsub.f32 %v4816_v52, %v4055_v9  ;;  %v4057_v14 = vpop.eup %4056 }
 0x58e   :  { %v1416_v49 = vmul.f32 %v4057_v14, %v1415_v13 }
 0x590   :  { %v1417_v40 = vadd.f32 %v4055_v9, %v1416_v49 }
 0x592   :  { %v5032_v16 = vsel %vm1423_vm4, %v1417_v40, %v4816_v52  ;;  %v5034_v36 = vsel %vm1423_vm4, %v1417_v40, 0.0  ;;  %v1658_v52 = vld [vmem:[%s5373_s5 + $0x28] sm:$0xff]  ;;  %v1644_v40 = vpop.permute.xlu0 %1643 }
 0x593   :  { %1544 = vmatmul.mubr.f32.vlgmr.msra.gmra.mrb[8].mxu1 %v5032_v16  ;;  %3194 = vmatmul.mubr.f32.vlgmr.msra.gmra.mrb[24].mxu0 %v5032_v16  ;;  %v5063_v47 = vpack.c.bf16 %v1658_v52, %v1655_v38  ;;  %vm1645_vm5 = vcmp.eq.s32.totalorder %v1644_v40, 1  ;;  %v2325_v40 = vld [vmem:[%s5376_s8 + $0x8] sm:$0xff] }
 0x594   :  { %3750 = vmatpush1.bf16.msra.mxu1 %v4845_v34  ;;  %1765 = vmatprep.mubr.f32.mxu1 %v4122_v0 }
 0x595   :  { %3752 = vmatprep.subr.bf16.mxu1 %v4855_v61  ;;  %3228 = vmatprep.mubr.msk.f32.mxu0 %vm4124_vm0, %v4122_v0 }
 0x596   :  { %3781 = vmatpush3.bf16.msra.mxu0 %v5063_v47 }
 0x597   :  { %3782 = vmatprep.subr.bf16.mxu0 %v4123_v1 }
 0x598   :  { %3754 = vmatpush1.bf16.msra.mxu1 %v4863_v3 }
 0x599   :  { %3756 = vmatprep.subr.bf16.mxu1 %v4873_v12 }
 0x59a   :  { %3784 = vmatpush3.bf16.msra.mxu0 %v5073_v7 }
 0x59b   :  { %3785 = vmatprep.subr.bf16.mxu0 %v4123_v1 }
 0x59c   :  { %3758 = vmatpush1.bf16.msra.mxu1 %v4881_v18 }
 0x59d   :  { %3760 = vmatprep.subr.bf16.mxu1 %v4891_v28 }
 0x59e   :  { %3787 = vmatpush3.bf16.msra.mxu0 %v5083_v31 }
 0x59f   :  { %3788 = vmatprep.subr.bf16.mxu0 %v4123_v1 }
 0x5a0   :  { %3762 = vmatpush1.bf16.msra.mxu1 %v4902_v35 }
 0x5a1   :  { %3764 = vmatprep.subr.bf16.mxu1 %v4918_v10 }
 0x5a2   :  { %3790 = vmatpush3.bf16.msra.mxu0 %v4908_v42 }
 0x5a3   :  { %3791 = vmatprep.subr.bf16.mxu0 %v4123_v1 }
 0x5a4   :  { %3766 = vmatpush1.bf16.msra.mxu1 %v4930_v30 }
 0x5a5   :  { %3768 = vmatprep.subr.bf16.mxu1 %v4944_v56 }
 0x5a6   :  { %3793 = vmatpush3.bf16.msra.mxu0 %v4942_v51 }
 0x5a7   :  { %3794 = vmatprep.subr.bf16.mxu0 %v4123_v1 }
 0x5a8   :  { %3770 = vmatpush1.bf16.msra.mxu1 %v4956_v5 }
 0x5a9   :  { %3772 = vmatprep.subr.bf16.mxu1 %v4971_v23 }
 0x5aa   :  { %3796 = vmatpush3.bf16.msra.mxu0 %v4969_v20 }
 0x5ab   :  { %3797 = vmatprep.subr.bf16.mxu0 %v4123_v1 }
 0x5ac   :  { %3774 = vmatpush1.bf16.msra.mxu1 %v4993_v53 }
 0x5ad   :  { %3776 = vmatprep.subr.bf16.mxu1 %v4999_v62 }
 0x5ae   :  { %3799 = vmatpush3.bf16.msra.mxu0 %v4997_v59 }
 0x5af   :  { %3800 = vmatprep.subr.bf16.mxu0 %v4123_v1 }
 0x5b0   :  { %3778 = vmatpush1.bf16.msra.mxu1 %v5015_v63 }
 0x5b1   :  { %3804 = vmatprep.subr.bf16.mxu1 %v4837_v55 }
 0x5b2   :  { %3802 = vmatpush3.bf16.msra.mxu0 %v5019_v21 }
 0x5b3   :  { %3835 = vmatprep.subr.bf16.mxu0 %v4123_v1 }
 0x666   :  { %v1545_v26 = vpop.f32.mrb[8].mxu1  ;;  %v1616_v33 = vpop.f32.mrb[24].mxu0 }
 0x667   :  { %v3980_v39 = vadd.f32 %v4718_v58, %v1545_v26  ;;  %v1547_v29 = vpop.f32.mrb[9].mxu1  ;;  %v3195_v8 = vpop.f32.mrb[25].mxu0  ;;  %v1617_v57 = vadd.f32 %v1616_v33, %v4724_v24 }
 0x668   :  { %v3982_v19 = vadd.f32 %v4721_v11, %v1547_v29 }
 0x669   :  { %v2706_v17 = vmul.f32 -1.442695, %v3980_v39 }
 0x66a   :  { %v2707_v27 = vmul.f32 -1.442695, %v3982_v19 }
 0x66b   :  { %4058 = vpow2.f32 %v2706_v17 }
 0x66c   :  { %4060 = vpow2.f32 %v2707_v27 }
 0x675   :  { %v4059_v37 = vpop.eup %4058 }
 0x676   :  { %v1624_v41 = vadd.f32 1.0, %v4059_v37  ;;  %v4061_v48 = vpop.eup %4060 }
 0x677   :  { %v1631_v13 = vadd.f32 1.0, %v4061_v48 }
 0x678   :  { %4062 = vrcp.f32 %v1624_v41 }
 0x682   :  { %v4063_v60 = vpop.eup %4062 }
 0x683   :  { %v1634_v4 = vmul.f32 %v4063_v60, %v1617_v57 }
 0x685   :  { %v1635_v9 = vadd.f32 %v1634_v4, %v4709_v44 }
 0x687   :  { %4064 = vtanh.f32 %v1635_v9  ;;  %v1866_v9 = vpop.permute.xlu1 %1865 }
 0x688   :  { %4066 = vrcp.f32 %v1631_v13  ;;  %vm1867_vm6 = vcmp.eq.s32.totalorder %v1866_v9, 1 }
 0x691   :  { %v4065_v14 = vpop.eup %4064 }
 0x692   :  { %v1637_v32 = vsub.f32 %v5032_v16, %v4065_v14  ;;  %v4067_v49 = vpop.eup %4066 }
 0x694   :  { %v1638_v38 = vmul.f32 %v4067_v49, %v1637_v32 }
 0x696   :  { %v1639_v52 = vadd.f32 %v4065_v14, %v1638_v38 }
 0x698   :  { %v5103_v2 = vsel %vm1645_vm5, %v1639_v52, %v5032_v16  ;;  %v5105_v6 = vsel %vm1645_vm5, %v1639_v52, 0.0  ;;  %v2326_v52 = vld [vmem:[%s5376_s8 + $0x10] sm:$0xff] }
 0x699   :  { %1766 = vmatmul.mubr.f32.vlgmr.msra.gmra.mrb[10].mxu1 %v5103_v2  ;;  %3229 = vmatmul.mubr.f32.vlgmr.msra.gmra.mrb[26].mxu0 %v5103_v2 }
 0x69a   :  { %3806 = vmatpush1.bf16.msra.mxu1 %v4845_v34  ;;  %3837 = vmatpush3.bf16.msra.mxu0 %v5063_v47 }
 0x69b   :  { %3808 = vmatprep.subr.bf16.mxu1 %v4855_v61  ;;  %3838 = vmatprep.subr.bf16.mxu0 %v4123_v1 }
 0x69c   :  { %1987 = vmatprep.mubr.f32.mxu1 %v4122_v0  ;;  %3263 = vmatprep.mubr.msk.f32.mxu0 %vm4124_vm0, %v4122_v0 }
 0x69e   :  { %3810 = vmatpush1.bf16.msra.mxu1 %v4863_v3  ;;  %3840 = vmatpush3.bf16.msra.mxu0 %v5073_v7 }
 0x69f   :  { %3812 = vmatprep.subr.bf16.mxu1 %v4873_v12  ;;  %3841 = vmatprep.subr.bf16.mxu0 %v4123_v1 }
 0x6a2   :  { %3814 = vmatpush1.bf16.msra.mxu1 %v4881_v18  ;;  %3843 = vmatpush3.bf16.msra.mxu0 %v5083_v31 }
 0x6a3   :  { %3816 = vmatprep.subr.bf16.mxu1 %v4891_v28  ;;  %3844 = vmatprep.subr.bf16.mxu0 %v4123_v1 }
 0x6a6   :  { %3818 = vmatpush1.bf16.msra.mxu1 %v4902_v35  ;;  %3846 = vmatpush3.bf16.msra.mxu0 %v4908_v42 }
 0x6a7   :  { %3820 = vmatprep.subr.bf16.mxu1 %v4918_v10  ;;  %3847 = vmatprep.subr.bf16.mxu0 %v4123_v1 }
 0x6aa   :  { %3822 = vmatpush1.bf16.msra.mxu1 %v4930_v30  ;;  %3849 = vmatpush3.bf16.msra.mxu0 %v4942_v51 }
 0x6ab   :  { %3824 = vmatprep.subr.bf16.mxu1 %v4944_v56  ;;  %3850 = vmatprep.subr.bf16.mxu0 %v4123_v1 }
 0x6ae   :  { %3826 = vmatpush1.bf16.msra.mxu1 %v4956_v5  ;;  %3852 = vmatpush3.bf16.msra.mxu0 %v4969_v20 }
 0x6af   :  { %3828 = vmatprep.subr.bf16.mxu1 %v4971_v23  ;;  %3853 = vmatprep.subr.bf16.mxu0 %v4123_v1 }
 0x6b2   :  { %3830 = vmatpush1.bf16.msra.mxu1 %v4993_v53  ;;  %3855 = vmatpush3.bf16.msra.mxu0 %v4997_v59 }
 0x6b3   :  { %3832 = vmatprep.subr.bf16.mxu1 %v4999_v62  ;;  %3856 = vmatprep.subr.bf16.mxu0 %v4123_v1 }
 0x6b6   :  { %3834 = vmatpush1.bf16.msra.mxu1 %v5015_v63  ;;  %3858 = vmatpush3.bf16.msra.mxu0 %v5019_v21 }
 0x6b7   :  { %3860 = vmatprep.subr.bf16.mxu1 %v4837_v55  ;;  %3891 = vmatprep.subr.bf16.mxu0 %v4123_v1 }
 0x76c   :  { %v1767_v44 = vpop.f32.mrb[10].mxu1  ;;  %v1838_v16 = vpop.f32.mrb[26].mxu0 }
 0x76d   :  { %v3984_v15 = vadd.f32 %v4718_v58, %v1767_v44  ;;  %v1769_v22 = vpop.f32.mrb[11].mxu1  ;;  %v3230_v26 = vpop.f32.mrb[27].mxu0  ;;  %v1839_v55 = vadd.f32 %v1838_v16, %v4724_v24  ;;  %v2328_v44 = vld [vmem:[%s5376_s8 + $0x20] sm:$0xff]  ;;  %v2329_v16 = vld [vmem:[%s5376_s8 + $0x28] sm:$0xff] }
 0x76e   :  { %v3986_v39 = vadd.f32 %v4721_v11, %v1769_v22  ;;  %v2330_v22 = vld [vmem:[%s5376_s8 + $0x30] sm:$0xff]  ;;  %v2331_v26 = vld [vmem:[%s5376_s8 + $0x38] sm:$0xff] }
 0x76f   :  { %v2708_v33 = vmul.f32 -1.442695, %v3984_v15  ;;  %v3922_v15 = vpack.c.bf16 %v2329_v16, %v2328_v44  ;;  %v2573_v44 = vld [vmem:[%s5377_s9 + $0x18] sm:$0xff] }
 0x770   :  { %v2709_v29 = vmul.f32 -1.442695, %v3986_v39  ;;  %v2332_v39 = vld [vmem:[%s5376_s8 + $0x40] sm:$0xff] }
 0x771   :  { %4068 = vpow2.f32 %v2708_v33  ;;  %v3925_v33 = vpack.c.bf16 %v2331_v26, %v2330_v22  ;;  %v2575_v22 = vld [vmem:[%s5377_s9 + $0x28] sm:$0xff] }
 0x772   :  { %4070 = vpow2.f32 %v2709_v29  ;;  %v2333_v29 = vld [vmem:[%s5376_s8 + $0x48] sm:$0xff] }
 0x77b   :  { %v4069_v8 = vpop.eup %4068 }
 0x77c   :  { %v1846_v17 = vadd.f32 1.0, %v4069_v8  ;;  %v4071_v19 = vpop.eup %4070  ;;  %v2334_v8 = vld [vmem:[%s5376_s8 + $0x50] sm:$0xff] }
 0x77d   :  { %v1853_v48 = vadd.f32 1.0, %v4071_v19  ;;  %v2335_v19 = vld [vmem:[%s5376_s8 + $0x58] sm:$0xff] }
 0x77e   :  { %4072 = vrcp.f32 %v1846_v17  ;;  %v3928_v17 = vpack.c.bf16 %v2333_v29, %v2332_v39 }
 0x788   :  { %v4073_v27 = vpop.eup %4072 }
 0x789   :  { %v1856_v37 = vmul.f32 %v4073_v27, %v1839_v55  ;;  %v3931_v55 = vpack.c.bf16 %v2335_v19, %v2334_v8  ;;  %v2336_v27 = vld [vmem:[%s5376_s8 + $0x60] sm:$0xff] }
 0x78b   :  { %v1857_v41 = vadd.f32 %v1856_v37, %v4707_v43  ;;  %v2337_v37 = vld [vmem:[%s5376_s8 + $0x68] sm:$0xff] }
 0x78d   :  { %4074 = vtanh.f32 %v1857_v41  ;;  %v3934_v41 = vpack.c.bf16 %v2337_v37, %v2336_v27 }
 0x78e   :  { %4076 = vrcp.f32 %v1853_v48  ;;  %v2338_v48 = vld [vmem:[%s5376_s8 + $0x70] sm:$0xff] }
 0x797   :  { %v4075_v57 = vpop.eup %4074 }
 0x798   :  { %v1859_v60 = vsub.f32 %v5103_v2, %v4075_v57  ;;  %v4077_v4 = vpop.eup %4076 }
 0x79a   :  { %v1860_v13 = vmul.f32 %v4077_v4, %v1859_v60 }
 0x79c   :  { %v1861_v14 = vadd.f32 %v4075_v57, %v1860_v13  ;;  %v2339_v57 = vld [vmem:[%s5376_s8 + $0x78] sm:$0xff] }
 0x79d   :  { %v3937_v60 = vpack.c.bf16 %v2339_v57, %v2338_v48 }
 0x79e   :  { %v5150_v32 = vsel %vm1867_vm6, %v1861_v14, %v5103_v2  ;;  %v5152_v49 = vsel %vm1867_vm6, %v1861_v14, 0.0 }
 0x79f   :  { %1988 = vmatmul.mubr.f32.vlgmr.msra.gmra.mrb[12].mxu1 %v5150_v32  ;;  %3264 = vmatmul.mubr.f32.vlgmr.msra.gmra.mrb[28].mxu0 %v5150_v32 }
 0x7a0   :  { %3862 = vmatpush1.bf16.msra.mxu1 %v4845_v34  ;;  %3893 = vmatpush3.bf16.msra.mxu0 %v5063_v47 }
 0x7a1   :  { %3864 = vmatprep.subr.bf16.mxu1 %v4855_v61  ;;  %3894 = vmatprep.subr.bf16.mxu0 %v4123_v1 }
 0x7a2   :  { %2209 = vmatprep.mubr.f32.mxu1 %v4122_v0  ;;  %3298 = vmatprep.mubr.msk.f32.mxu0 %vm4124_vm0, %v4122_v0 }
 0x7a4   :  { %3866 = vmatpush1.bf16.msra.mxu1 %v4863_v3  ;;  %3896 = vmatpush3.bf16.msra.mxu0 %v5073_v7 }
 0x7a5   :  { %3868 = vmatprep.subr.bf16.mxu1 %v4873_v12  ;;  %3897 = vmatprep.subr.bf16.mxu0 %v4123_v1 }
 0x7a8   :  { %3870 = vmatpush1.bf16.msra.mxu1 %v4881_v18  ;;  %3899 = vmatpush3.bf16.msra.mxu0 %v5083_v31 }
 0x7a9   :  { %3872 = vmatprep.subr.bf16.mxu1 %v4891_v28  ;;  %3900 = vmatprep.subr.bf16.mxu0 %v4123_v1 }
 0x7ac   :  { %3874 = vmatpush1.bf16.msra.mxu1 %v4902_v35  ;;  %3902 = vmatpush3.bf16.msra.mxu0 %v4908_v42 }
 0x7ad   :  { %3876 = vmatprep.subr.bf16.mxu1 %v4918_v10  ;;  %3903 = vmatprep.subr.bf16.mxu0 %v4123_v1 }
 0x7b0   :  { %3878 = vmatpush1.bf16.msra.mxu1 %v4930_v30  ;;  %3905 = vmatpush3.bf16.msra.mxu0 %v4942_v51 }
 0x7b1   :  { %3880 = vmatprep.subr.bf16.mxu1 %v4944_v56  ;;  %3906 = vmatprep.subr.bf16.mxu0 %v4123_v1 }
 0x7b4   :  { %3882 = vmatpush1.bf16.msra.mxu1 %v4956_v5  ;;  %3908 = vmatpush3.bf16.msra.mxu0 %v4969_v20 }
 0x7b5   :  { %3884 = vmatprep.subr.bf16.mxu1 %v4971_v23  ;;  %3909 = vmatprep.subr.bf16.mxu0 %v4123_v1 }
 0x7b8   :  { %3886 = vmatpush1.bf16.msra.mxu1 %v4993_v53  ;;  %3911 = vmatpush3.bf16.msra.mxu0 %v4997_v59 }
 0x7b9   :  { %3888 = vmatprep.subr.bf16.mxu1 %v4999_v62  ;;  %3912 = vmatprep.subr.bf16.mxu0 %v4123_v1 }
 0x7bc   :  { %3890 = vmatpush1.bf16.msra.mxu1 %v5015_v63  ;;  %3914 = vmatpush3.bf16.msra.mxu0 %v5019_v21  ;;  %v2088_v63 = vpop.permute.xlu0 %2087 }
 0x7bd   :  { %3915 = vmatprep.subr.bf16.mxu1 %v4123_v1  ;;  %3939 = vmatprep.subr.bf16.mxu0 %v4123_v1  ;;  %vm2089_vm7 = vcmp.eq.s32.totalorder %v2088_v63, 1 }
 0x872   :  { %v1989_v43 = vpop.f32.mrb[12].mxu1  ;;  %v2060_v34 = vpop.f32.mrb[28].mxu0 }
 0x873   :  { %v3988_v61 = vadd.f32 %v4718_v58, %v1989_v43  ;;  %v1991_v3 = vpop.f32.mrb[13].mxu1  ;;  %v3265_v12 = vpop.f32.mrb[29].mxu0  ;;  %v2061_v51 = vadd.f32 %v2060_v34, %v4724_v24 }
 0x874   :  { %v3990_v28 = vadd.f32 %v4721_v11, %v1991_v3 }
 0x875   :  { %v2710_v18 = vmul.f32 -1.442695, %v3988_v61 }
 0x876   :  { %v2711_v35 = vmul.f32 -1.442695, %v3990_v28 }
 0x877   :  { %4078 = vpow2.f32 %v2710_v18 }
 0x878   :  { %4080 = vpow2.f32 %v2711_v35 }
 0x881   :  { %v4079_v42 = vpop.eup %4078 }
 0x882   :  { %v2068_v10 = vadd.f32 1.0, %v4079_v42  ;;  %v4081_v30 = vpop.eup %4080 }
 0x883   :  { %v2075_v23 = vadd.f32 1.0, %v4081_v30 }
 0x884   :  { %4082 = vrcp.f32 %v2068_v10 }
 0x88e   :  { %v4083_v56 = vpop.eup %4082 }
 0x88f   :  { %v2078_v5 = vmul.f32 %v4083_v56, %v2061_v51 }
 0x891   :  { %v2079_v20 = vadd.f32 %v2078_v5, %v4713_v50  ;;  %v2324_v50 = vld [vmem:[%s5376_s8] sm:$0xff] }
 0x892   :  { %v3916_v38 = vpack.c.bf16 %v2325_v40, %v2324_v50 }
 0x893   :  { %4084 = vtanh.f32 %v2079_v20 }
 0x894   :  { %4086 = vrcp.f32 %v2075_v23 }
 0x89d   :  { %v4085_v53 = vpop.eup %4084 }
 0x89e   :  { %v2081_v59 = vsub.f32 %v5150_v32, %v4085_v53  ;;  %v4087_v62 = vpop.eup %4086 }
 0x8a0   :  { %v2082_v21 = vmul.f32 %v4087_v62, %v2081_v59 }
 0x8a2   :  { %v2083_v47 = vadd.f32 %v4085_v53, %v2082_v21 }
 0x8a4   :  { %v5197_v7 = vsel %vm2089_vm7, %v2083_v47, %v5150_v32  ;;  %v5199_v31 = vsel %vm2089_vm7, %v2083_v47, 0.0 }
 0x8a5   :  { %2210 = vmatmul.mubr.f32.vlgmr.msra.gmra.mrb[14].mxu1 %v5197_v7  ;;  %3299 = vmatmul.mubr.f32.vlgmr.msra.gmra.mrb[30].mxu0 %v5197_v7 }
 0x8a6   :  { %3333 = vmatprep.mubr.msk.f32.mxu1 %vm4124_vm0, %v4122_v0  ;;  %3368 = vmatprep.mubr.msk.f32.mxu0 %vm4124_vm0, %v4122_v0  ;;  %v2327_v0 = vld [vmem:[%s5376_s8 + $0x18] sm:$0xff] }
 0x8a7   :  { %3917 = vmatpush3.bf16.msra.mxu1 %v3916_v38  ;;  %v3919_v2 = vpack.c.bf16 %v2327_v0, %v2326_v52  ;;  %v2570_v38 = vld [vmem:[%s5377_s9] sm:$0xff]  ;;  %v2571_v52 = vld [vmem:[%s5377_s9 + $0x8] sm:$0xff]  ;;  %v2572_v0 = vld [vmem:[%s5377_s9 + $0x10] sm:$0xff] }
 0x8a8   :  { %3918 = vmatprep.subr.bf16.mxu1 %v4123_v1  ;;  %v3943_v16 = vpack.c.bf16 %v2573_v44, %v2572_v0 }
 0x8ab   :  { %3920 = vmatpush3.bf16.msra.mxu1 %v3919_v2  ;;  %v3940_v2 = vpack.c.bf16 %v2571_v52, %v2570_v38 }
 0x8ac   :  { %3921 = vmatprep.subr.bf16.mxu1 %v4123_v1 }
 0x8ad   :  { %3941 = vmatpush3.bf16.msra.mxu0 %v3940_v2 }
 0x8ae   :  { %3942 = vmatprep.subr.bf16.mxu0 %v4123_v1 }
 0x8af   :  { %3923 = vmatpush3.bf16.msra.mxu1 %v3922_v15  ;;  %v2574_v15 = vld [vmem:[%s5377_s9 + $0x20] sm:$0xff] }
 0x8b0   :  { %3924 = vmatprep.subr.bf16.mxu1 %v4123_v1  ;;  %v3946_v26 = vpack.c.bf16 %v2575_v22, %v2574_v15 }
 0x8b1   :  { %3944 = vmatpush3.bf16.msra.mxu0 %v3943_v16 }
 0x8b2   :  { %3945 = vmatprep.subr.bf16.mxu0 %v4123_v1 }
 0x8b3   :  { %3926 = vmatpush3.bf16.msra.mxu1 %v3925_v33 }
 0x8b4   :  { %3927 = vmatprep.subr.bf16.mxu1 %v4123_v1 }
 0x8b5   :  { %3947 = vmatpush3.bf16.msra.mxu0 %v3946_v26 }
 0x8b6   :  { %3948 = vmatprep.subr.bf16.mxu0 %v4123_v1 }
 0x8b7   :  { %3929 = vmatpush3.bf16.msra.mxu1 %v3928_v17  ;;  %v2434_v17 = vld [vmem:[%s5378_s2] sm:$0xff] }
 0x8b8   :  { %3930 = vmatprep.subr.bf16.mxu1 %v4123_v1  ;;  %vm2436_vm9 = vcmp.ge.s32.totalorder %v2434_v17, 1  ;;  %vm2439_vm10 = vcmp.ge.s32.totalorder %v2434_v17, 4  ;;  %vm2441_vm11 = vcmp.ge.s32.totalorder %v2434_v17, 6  ;;  %vm2440_vm12 = vcmp.ge.s32.totalorder %v2434_v17, 5 }
 0x8b9   :  { %vm2435_vm14 = vcmp.ge.s32.totalorder %v2434_v17, 0  ;;  %vm2437_vm15 = vcmp.ge.s32.totalorder %v2434_v17, 2  ;;  %vm2438_vm0 = vcmp.ge.s32.totalorder %v2434_v17, 3  ;;  %vm2442_vm1 = vcmp.ge.s32.totalorder %v2434_v17, 7 }
 0x8bb   :  { %3932 = vmatpush3.bf16.msra.mxu1 %v3931_v55 }
 0x8bc   :  { %3933 = vmatprep.subr.bf16.mxu1 %v4123_v1 }
 0x8bf   :  { %3935 = vmatpush3.bf16.msra.mxu1 %v3934_v41 }
 0x8c0   :  { %3936 = vmatprep.subr.bf16.mxu1 %v4123_v1 }
 0x8c3   :  { %3938 = vmatpush3.bf16.msra.mxu1 %v3937_v60 }
 0x978   :  { %v2211_v4 = vpop.f32.mrb[14].mxu1  ;;  %v2282_v9 = vpop.f32.mrb[30].mxu0 }
 0x979   :  { %v3992_v13 = vadd.f32 %v4718_v58, %v2211_v4  ;;  %v2213_v14 = vpop.f32.mrb[15].mxu1  ;;  %v3300_v32 = vpop.f32.mrb[31].mxu0  ;;  %v2283_v28 = vadd.f32 %v2282_v9, %v4724_v24 }
 0x97a   :  { %v3994_v34 = vadd.f32 %v4721_v11, %v2213_v14  ;;  %v2310_v11 = vpop.permute.xlu1 %2309 }
 0x97b   :  { %v2712_v43 = vmul.f32 -1.442695, %v3992_v13  ;;  %vm2311_vm8 = vcmp.eq.s32.totalorder %v2310_v11, 1 }
 0x97c   :  { %v2713_v61 = vmul.f32 -1.442695, %v3994_v34 }
 0x97d   :  { %4088 = vpow2.f32 %v2712_v43 }
 0x97e   :  { %4090 = vpow2.f32 %v2713_v61 }
 0x987   :  { %v4089_v3 = vpop.eup %4088 }
 0x988   :  { %v2290_v12 = vadd.f32 1.0, %v4089_v3  ;;  %v4091_v18 = vpop.eup %4090 }
 0x989   :  { %v2297_v30 = vadd.f32 1.0, %v4091_v18 }
 0x98a   :  { %4092 = vrcp.f32 %v2290_v12 }
 0x994   :  { %v4093_v35 = vpop.eup %4092 }
 0x995   :  { %v2300_v42 = vmul.f32 %v4093_v35, %v2283_v28 }
 0x997   :  { %v2301_v10 = vadd.f32 %v2300_v42, %v4711_v46 }
 0x999   :  { %4094 = vtanh.f32 %v2301_v10 }
 0x99a   :  { %4096 = vrcp.f32 %v2297_v30 }
 0x9a3   :  { %v4095_v58 = vpop.eup %4094 }
 0x9a4   :  { %v2303_v51 = vsub.f32 %v5197_v7, %v4095_v58  ;;  %v4097_v56 = vpop.eup %4096 }
 0x9a6   :  { %v2304_v5 = vmul.f32 %v4097_v56, %v2303_v51 }
 0x9a8   :  { %v2305_v20 = vadd.f32 %v4095_v58, %v2304_v5 }
 0x9aa   :  { %v2315_v23 = vsel %vm2311_vm8, %v2305_v20, %v5197_v7  ;;  %v5268_v53 = vsel %vm2311_vm8, %v2305_v20, 0.0 }
 0x9ab   :  { %3334 = vmatmul.mubr.f32.vlgmr.msra.gmra.mrb[16].mxu1 %v2315_v23 }
 0xa7e   :  { %v2406_v24 = vpop.f32.mrb[16].mxu1 }
 0xa7f   :  { %v3335_v59 = vpop.f32.mrb[17].mxu1  ;;  %v2411_v46 = vmul.f32 %v2406_v24, %v4772_v45  ;;  %v2410_v62 = vmul.f32 %v2406_v24, %v4727_v25  ;;  %v2414_v63 = vmul.f32 %v2406_v24, %v5105_v6  ;;  %v2412_v21 = vmul.f32 %v2406_v24, %v4818_v54 }
 0xa80   :  { %v2413_v47 = vmul.f32 %v2406_v24, %v5034_v36  ;;  %v2416_v7 = vmul.f32 %v2406_v24, %v5199_v31  ;;  %v2415_v50 = vmul.f32 %v2406_v24, %v5152_v49  ;;  %v2417_v40 = vmul.f32 %v2406_v24, %v5268_v53 }
 0xa81   :  { %2420 = vadd.xlane.f32.xlu1 %v2411_v46  ;;  %2418 = vadd.xlane.f32.xlu0 %v2410_v62 }
 0xa85   :  { %2426 = vadd.xlane.f32.xlu1 %v2414_v63  ;;  %2422 = vadd.xlane.f32.xlu0 %v2412_v21 }
 0xa89   :  { %2424 = vadd.xlane.f32.xlu0 %v2413_v47  ;;  %2430 = vadd.xlane.f32.xlu1 %v2416_v7 }
 0xa8d   :  { %2428 = vadd.xlane.f32.xlu0 %v2415_v50 }
 0xa91   :  { %2432 = vadd.xlane.f32.xlu0 %v2417_v40 }
 0xb0e   :  { %v2421_v33 = vpop.xlane.xlu1 %2420  ;;  %v2419_v39 = vpop.xlane.xlu0 %2418 }
 0xb0f   :  { %v2444_v37 = vsel %vm2436_vm9, %v2421_v33, -inf  ;;  %v2443_v4 = vsel %vm2435_vm14, %v2419_v39, -inf }
 0xb10   :  { %v2453_v14 = vsel %vm2451_vm13, %v2444_v37, -inf  ;;  %v2452_v12 = vsel %vm2451_vm13, %v2443_v4, -inf }
 0xb12   :  { %v2427_v29 = vpop.xlane.xlu1 %2426  ;;  %v2423_v8 = vpop.xlane.xlu0 %2422 }
 0xb13   :  { %v2447_v41 = vsel %vm2439_vm10, %v2427_v29, -inf  ;;  %v2445_v9 = vsel %vm2437_vm15, %v2423_v8, -inf }
 0xb14   :  { %v2456_v32 = vsel %vm2451_vm13, %v2447_v41, -inf  ;;  %v2454_v18 = vsel %vm2451_vm13, %v2445_v9, -inf }
 0xb15   :  { %v2457_v42 = vmax.f32 %v2452_v12, %v2456_v32  ;;  %v2577_v12 = vld [vmem:[%s5377_s9 + $0x38] sm:$0xff] }
 0xb16   :  { %v2425_v19 = vpop.xlane.xlu0 %2424  ;;  %v2431_v55 = vpop.xlane.xlu1 %2430 }
 0xb17   :  { %v2449_v48 = vsel %vm2441_vm11, %v2431_v55, -inf  ;;  %v2446_v13 = vsel %vm2438_vm0, %v2425_v19, -inf }
 0xb18   :  { %v2460_v43 = vsel %vm2451_vm13, %v2449_v48, -inf  ;;  %v2455_v28 = vsel %vm2451_vm13, %v2446_v13, -inf }
 0xb19   :  { %v2461_v10 = vmax.f32 %v2454_v18, %v2460_v43 }
 0xb1a   :  { %v2429_v27 = vpop.xlane.xlu0 %2428 }
 0xb1b   :  { %v2448_v57 = vsel %vm2440_vm12, %v2429_v27, -inf }
 0xb1c   :  { %v2458_v60 = vsel %vm2451_vm13, %v2448_v57, -inf }
 0xb1d   :  { %v2459_v61 = vmax.f32 %v2453_v14, %v2458_v60 }
 0xb1e   :  { %v2433_v34 = vpop.xlane.xlu0 %2432 }
 0xb1f   :  { %v2450_v3 = vsel %vm2442_vm1, %v2433_v34, -inf  ;;  %v2464_v58 = vmax.f32 %v2457_v42, %v2459_v61  ;;  %v2578_v42 = vld [vmem:[%s5377_s9 + $0x40] sm:$0xff] }
 0xb20   :  { %v2462_v35 = vsel %vm2451_vm13, %v2450_v3, -inf }
 0xb21   :  { %v2463_v30 = vmax.f32 %v2455_v28, %v2462_v35 }
 0xb23   :  { %v2465_v51 = vmax.f32 %v2461_v10, %v2463_v30  ;;  %v2579_v10 = vld [vmem:[%s5377_s9 + $0x48] sm:$0xff] }
 0xb24   :  { %v3952_v30 = vpack.c.bf16 %v2579_v10, %v2578_v42 }
 0xb25   :  { %v2466_v56 = vmax.f32 %v2464_v58, %v2465_v51  ;;  %v2580_v51 = vld [vmem:[%s5377_s9 + $0x50] sm:$0xff] }
 0xb27   :  { %v2467_v11 = vsub.f32 %v2443_v4, %v2466_v56  ;;  %v2468_v5 = vsub.f32 %v2444_v37, %v2466_v56  ;;  %v2469_v20 = vsub.f32 %v2445_v9, %v2466_v56  ;;  %v2470_v23 = vsub.f32 %v2446_v13, %v2466_v56 }
 0xb28   :  { %v2471_v24 = vsub.f32 %v2447_v41, %v2466_v56  ;;  %v2472_v63 = vsub.f32 %v2448_v57, %v2466_v56  ;;  %v2473_v47 = vsub.f32 %v2449_v48, %v2466_v56  ;;  %v2474_v50 = vsub.f32 %v2450_v3, %v2466_v56  ;;  %v2576_v3 = vld [vmem:[%s5377_s9 + $0x30] sm:$0xff]  ;;  %v2581_v56 = vld [vmem:[%s5377_s9 + $0x58] sm:$0xff] }
 0xb29   :  { %v2475_v59 = vmul.f32 1.442695, %v2467_v11  ;;  %v2477_v46 = vmul.f32 1.442695, %v2468_v5  ;;  %v2479_v62 = vmul.f32 1.442695, %v2469_v20  ;;  %v3949_v18 = vpack.c.bf16 %v2577_v12, %v2576_v3 }
 0xb2a   :  { %v2481_v21 = vmul.f32 1.442695, %v2470_v23  ;;  %v2483_v7 = vmul.f32 1.442695, %v2471_v24  ;;  %v2485_v40 = vmul.f32 1.442695, %v2472_v63  ;;  %v3955_v11 = vpack.c.bf16 %v2581_v56, %v2580_v51 }
 0xb2b   :  { %4098 = vpow2.f32 %v2475_v59  ;;  %v2487_v38 = vmul.f32 1.442695, %v2473_v47  ;;  %v2489_v52 = vmul.f32 1.442695, %v2474_v50  ;;  %3950 = vmatpush3.bf16.msra.mxu0 %v3949_v18  ;;  %v2582_v20 = vld [vmem:[%s5377_s9 + $0x60] sm:$0xff]  ;;  %v2583_v23 = vld [vmem:[%s5377_s9 + $0x68] sm:$0xff] }
 0xb2c   :  { %4100 = vpow2.f32 %v2477_v46  ;;  %3951 = vmatprep.subr.bf16.mxu0 %v4123_v1  ;;  %v3958_v24 = vpack.c.bf16 %v2583_v23, %v2582_v20  ;;  %v2584_v59 = vld [vmem:[%s5377_s9 + $0x70] sm:$0xff]  ;;  %v2585_v46 = vld [vmem:[%s5377_s9 + $0x78] sm:$0xff] }
 0xb2d   :  { %4102 = vpow2.f32 %v2479_v62  ;;  %v3961_v62 = vpack.c.bf16 %v2585_v46, %v2584_v59 }
 0xb2e   :  { %4104 = vpow2.f32 %v2481_v21 }
 0xb2f   :  { %4106 = vpow2.f32 %v2483_v7  ;;  %3953 = vmatpush3.bf16.msra.mxu0 %v3952_v30 }
 0xb30   :  { %4108 = vpow2.f32 %v2485_v40  ;;  %3954 = vmatprep.subr.bf16.mxu0 %v4123_v1 }
 0xb31   :  { %4110 = vpow2.f32 %v2487_v38 }
 0xb32   :  { %4112 = vpow2.f32 %v2489_v52 }
 0xb33   :  { %3956 = vmatpush3.bf16.msra.mxu0 %v3955_v11 }
 0xb34   :  { %3957 = vmatprep.subr.bf16.mxu0 %v4123_v1 }
 0xb35   :  { %v4099_v0 = vpop.eup %4098 }
 0xb36   :  { %v4101_v2 = vpop.eup %4100  ;;  %v2491_v44 = vsel %vm2451_vm13, %v4099_v0, 0.0 }
 0xb37   :  { %v4103_v16 = vpop.eup %4102  ;;  %v2492_v15 = vsel %vm2451_vm13, %v4101_v2, 0.0  ;;  %3959 = vmatpush3.bf16.msra.mxu0 %v3958_v24 }
 0xb38   :  { %v4105_v22 = vpop.eup %4104  ;;  %v2493_v26 = vadd.f32 %v2492_v15, %v2491_v44  ;;  %v2494_v33 = vsel %vm2451_vm13, %v4103_v16, 0.0  ;;  %3960 = vmatprep.subr.bf16.mxu0 %v4123_v1 }
 0xb39   :  { %v4107_v39 = vpop.eup %4106  ;;  %v2496_v8 = vsel %vm2451_vm13, %v4105_v22, 0.0 }
 0xb3a   :  { %v2495_v29 = vadd.f32 %v2494_v33, %v2493_v26  ;;  %v4109_v17 = vpop.eup %4108  ;;  %v2498_v55 = vsel %vm2451_vm13, %v4107_v39, 0.0 }
 0xb3b   :  { %v4111_v27 = vpop.eup %4110  ;;  %v2500_v41 = vsel %vm2451_vm13, %v4109_v17, 0.0  ;;  %3962 = vmatpush3.bf16.msra.mxu0 %v3961_v62 }
 0xb3c   :  { %v2497_v19 = vadd.f32 %v2496_v8, %v2495_v29  ;;  %v4113_v48 = vpop.eup %4112  ;;  %v2502_v60 = vsel %vm2451_vm13, %v4111_v27, 0.0 }
 0xb3d   :  { %v2504_v9 = vsel %vm2451_vm13, %v4113_v48, 0.0 }
 0xb3e   :  { %v2499_v37 = vadd.f32 %v2498_v55, %v2497_v19 }
 0xb40   :  { %v2501_v57 = vadd.f32 %v2500_v41, %v2499_v37 }
 0xb42   :  { %v2503_v4 = vadd.f32 %v2502_v60, %v2501_v57 }
 0xb44   :  { %v2505_v13 = vadd.f32 %v2504_v9, %v2503_v4 }
 0xb46   :  { %4114 = vrcp.f32 %v2505_v13 }
 0xb50   :  { %v4115_v14 = vpop.eup %4114 }
 0xb51   :  { %v2508_v32 = vmul.f32 %v4115_v14, %v4101_v2  ;;  %v2507_v43 = vmul.f32 %v4115_v14, %v4099_v0  ;;  %v2511_v34 = vmul.f32 %v4115_v14, %v4107_v39  ;;  %v2509_v61 = vmul.f32 %v4115_v14, %v4103_v16 }
 0xb52   :  { %v2513_v28 = vmul.f32 %v4115_v14, %v4111_v27  ;;  %v2510_v35 = vmul.f32 %v4115_v14, %v4105_v22  ;;  %v2512_v58 = vmul.f32 %v4115_v14, %v4109_v17  ;;  %v2514_v5 = vmul.f32 %v4115_v14, %v4113_v48 }
 0xb53   :  { %2522 = vperm.xlu0 %4016, %v2508_v32   ;;  %2517 = vperm.xlu1 %4017, %v2507_v43  }
 0xb57   :  { %2537 = vperm.xlu0 %4016, %v2511_v34   ;;  %2527 = vperm.xlu1 %4017, %v2509_v61  }
 0xb5b   :  { %2547 = vperm.xlu0 %4016, %v2513_v28   ;;  %2532 = vperm.xlu1 %4017, %v2510_v35  }
 0xb5f   :  { %2542 = vperm.xlu1 %4017, %v2512_v58  }
 0xb63   :  { %2552 = vperm.xlu1 %4017, %v2514_v5  }
 0xbd2   :  { %v2523_v63 = vpop.permute.xlu0 %2522  ;;  %v2518_v21 = vpop.permute.xlu1 %2517 }
 0xbd3   :  { %v2556_v47 = vmul.f32 %v2523_v63, %v4772_v45  ;;  %v2555_v7 = vmul.f32 %v2518_v21, %v4727_v25 }
 0xbd5   :  { %v2563_v38 = vadd.f32 %v2556_v47, %v2555_v7 }
 0xbd6   :  { %v2528_v50 = vpop.permute.xlu1 %2527  ;;  %v2538_v1 = vpop.permute.xlu0 %2537 }
 0xbd7   :  { %v2557_v40 = vmul.f32 %v2528_v50, %v4818_v54  ;;  %v2559_v44 = vmul.f32 %v2538_v1, %v5105_v6 }
 0xbd9   :  { %v2564_v0 = vadd.f32 %v2563_v38, %v2557_v40 }
 0xbda   :  { %v2533_v52 = vpop.permute.xlu1 %2532  ;;  %v2548_v15 = vpop.permute.xlu0 %2547 }
 0xbdb   :  { %v2558_v2 = vmul.f32 %v2533_v52, %v5034_v36  ;;  %v2561_v45 = vmul.f32 %v2548_v15, %v5199_v31  ;;  %v2714_v36 = vld [vmem:[%s5379_s10] ss:$0 sm:$0xff] }
 0xbdd   :  { %v2565_v16 = vadd.f32 %v2564_v0, %v2558_v2 }
 0xbde   :  { %v2543_v22 = vpop.permute.xlu1 %2542 }
 0xbdf   :  { %v2566_v26 = vadd.f32 %v2565_v16, %v2559_v44  ;;  %v2560_v33 = vmul.f32 %v2543_v22, %v5152_v49 }
 0xbe1   :  { %v2567_v25 = vadd.f32 %v2566_v26, %v2560_v33 }
 0xbe2   :  { %v2553_v39 = vpop.permute.xlu1 %2552 }
 0xbe3   :  { %v2568_v29 = vadd.f32 %v2567_v25, %v2561_v45  ;;  %v2562_v54 = vmul.f32 %v2553_v39, %v5268_v53 }
 0xbe5   :  { %v2569_v8 = vadd.f32 %v2568_v29, %v2562_v54 }
 0xbe7   :  { %3369 = vmatmul.mubr.f32.vlgmr.msra.gmra.mrb[32].mxu0 %v2569_v8 }
 0xcba   :  { %v2659_v6 = vpop.f32.mrb[32].mxu0 }
 0xcbb   :  { %v2660_v17 = vadd.f32 %v2714_v36, %v2659_v6  ;;  %v3370_v19 = vpop.f32.mrb[33].mxu0 }
 0xcbd   :  { %v2664_v55 = vsel %vm2663_vm2, %v2660_v17, -inf }
 0xcbe   :  { %2665 = vmax.xlane.f32.xlu0 %v2664_v55 }
 0xd4b   :  { %v2666_v49 = vpop.xlane.xlu0 %2665 }
 0xd4c   :  { %v2667_v31 = vsub.f32 %v2660_v17, %v2666_v49 }
 0xd4e   :  { %v2668_v27 = vmul.f32 1.442695, %v2667_v31 }
 0xd50   :  { %4116 = vpow2.f32 %v2668_v27 }
 0xd5a   :  { %v4117_v37 = vpop.eup %4116 }
 0xd5b   :  { %v2670_v53 = vsel %vm2663_vm2, %v4117_v37, 0.0 }
 0xd5c   :  { %2671 = vadd.xlane.f32.xlu1 %v2670_v53 }
 0xde9   :  { %v2672_v41 = vpop.xlane.xlu1 %2671 }
 0xdea   :  { %4118 = vrcp.f32 %v2672_v41 }
 0xdf4   :  { %v4119_v48 = vpop.eup %4118 }
 0xdf5   :  { %v2674_v57 = vmul.f32 %v4119_v48, %v4117_v37 }
 0xdf7   :  { %2675 = vst.msk [vmem:[%s5380_s11] sm:$0xff] %vm2663_vm2, %v2674_v57 }

</bundles_post_ra>
